<compile_context>
chip_gen: v7x
topology: tpu7x:2x2x1
jax: 0.10.0
libtpu: 0.0.40
codegen_flags: <defaults>
</compile_context>

<pallas_src>
import functools
import math

import jax
import jax.numpy as jnp
from jax.experimental import pallas as pl
from jax.experimental.pallas import tpu as pltpu


def _round_up(x, m):
    return ((x + m - 1) // m) * m


def _lcm(a, b):
    return a * b // math.gcd(a, b)


def _vmem_capacity_bytes():
    """Per-generation VMEM capacity (v5e/v6e: 128 MiB, v7x: 64 MiB); safe fallback."""
    try:
        info = pltpu.get_tpu_info()
        cap = getattr(info, "vmem_capacity_bytes", None)
        if cap:
            return int(cap)
    except Exception:
        pass
    return 64 << 20  # conservative (v7x-sized) default


def _vmem_bytes(shape, itemsize):
    """Approx. Mosaic VMEM footprint of one buffer: last dim padded to 128 lanes,
    second-to-last padded to the native sublane multiple (8 for 4B, 16 for 2B)."""
    *lead, s, l = shape
    sub = 8 * (4 // itemsize)
    n = 1
    for d in lead:
        n *= int(d)
    return n * _round_up(int(s), sub) * _round_up(int(l), 128) * itemsize


def _rebnconv_kernel(x_main_ref, x_halo_ref, w_ref, scale_ref, bias_ref, o_ref,
                     lhs_ref, *, TH, W, Cinp, Coutp, pad, acc_in_out):
    """One grid step == one (batch, H-tile).

    x_main_ref : (1, TH, Wp, Cinp)        bf16  rows [ti*TH, ti*TH+TH) of padded input
    x_halo_ref : (1, 2*pad, Wp, Cinp)     bf16  halo rows [ti*TH+TH, ti*TH+TH+2*pad)
    w_ref      : (3, 3*Cinp, Coutp)       bf16  weights, kh x (kw-major, ci) x co
    scale_ref  : (1, Coutp)               f32   folded BN scale
    bias_ref   : (1, Coutp)               f32   folded BN bias (incl. conv bias)
    o_ref      : (1, TH, W, Coutp)        f32 (or bf16)
    lhs_ref    : (TH+2*pad, W, 3*Cinp)    bf16  scratch: kw-folded im2col window
    """
    # ---- stage the kw-folded im2col LHS directly from the (main, halo) input blocks ----
    # Each input byte is copied exactly once per kw shift; no separate window stitch.
    for kw in range(3):
        c0 = kw * Cinp
        lhs_ref[0:TH, :, c0:c0 + Cinp] = x_main_ref[0, :, kw * pad:kw * pad + W, :]
        lhs_ref[TH:TH + 2 * pad, :, c0:c0 + Cinp] = x_halo_ref[0, :, kw * pad:kw * pad + W, :]

    scale = scale_ref[...].reshape(1, 1, Coutp)
    bias = bias_ref[...].reshape(1, 1, Coutp)

    # 3 MXU matmuls (K = 3*Cinp) instead of 9 (K = Cinp).  kh row selection below is a
    # slice along the untiled leading axis of lhs_ref -> pure address offset, no copy.
    if acc_in_out:
        # f32 output: accumulate directly in the block-resident output (no acc scratch);
        # BN + ReLU epilogue fused into the last accumulation.
        for kh in range(3):
            lhs = lhs_ref[kh * pad:kh * pad + TH, :, :]            # (TH, W, 3*Cinp) bf16
            part = jax.lax.dot_general(
                lhs, w_ref[kh],
                dimension_numbers=(((2,), (0,)), ((), ())),
                preferred_element_type=jnp.float32)                # (TH, W, Coutp) f32
            if kh == 0:
                o_ref[0, :, :, :] = part
            elif kh == 1:
                o_ref[0, :, :, :] += part
            else:
                o_ref[0, :, :, :] = jnp.maximum(
                    (o_ref[0, :, :, :] + part) * scale + bias, 0.0)
    else:
        # bf16 (or other) output path: traced f32 accumulator, cast only at the end.
        acc = None
        for kh in range(3):
            lhs = lhs_ref[kh * pad:kh * pad + TH, :, :]
            part = jax.lax.dot_general(
                lhs, w_ref[kh],
                dimension_numbers=(((2,), (0,)), ((), ())),
                preferred_element_type=jnp.float32)
            acc = part if acc is None else acc + part
        o_ref[0, :, :, :] = jnp.maximum(acc * scale + bias, 0.0).astype(o_ref.dtype)


def rebnconv_pallas(x_nchw, conv_w_oihw, conv_b, bn_gamma, bn_beta, bn_mean, bn_var,
                    *, dirate=1, eps=1e-5, out_dtype=jnp.float32):
    """REBNCONV forward. Input/output are NCHW (PyTorch convention); output dtype optional."""
    B, Cin, H, W = x_nchw.shape
    Cout = conv_w_oihw.shape[0]
    p = int(dirate)
    Wp = W + 2 * p

    # Channel padding: Cin -> multiple of 16 (bf16 packing).  Cout: lane-dense 128-pad only
    # when Cout is already large; small-Cout layers pad to 8 to avoid inflating f32 HBM
    # writeback (and epilogue work) up to 8x for zero channels.
    Cinp = _round_up(Cin, 16)
    Coutp = _round_up(Cout, 128) if Cout > 64 else _round_up(Cout, 8)

    out_itemsize = 4 if out_dtype == jnp.float32 else 2

    # ---- per-generation VMEM budget / tile-size selection (lane/sublane-padding aware) ----
    cap = _vmem_capacity_bytes()
    if cap >= (100 << 20):                       # v5e / v6e: 128 MiB physical
        vmem_limit = 112 << 20
    else:                                        # v7x: 64 MiB physical
        vmem_limit = max(32 << 20, min(cap - (8 << 20), 54 << 20))

    # TH must be a multiple of 8 (sublanes) and of 2*dirate (halo BlockSpec addressing).
    q = _lcm(2 * p, 8)
    per_row = (2 * _vmem_bytes((1, Wp, Cinp), 2)            # input main block (2 pipeline bufs)
               + 2 * _vmem_bytes((1, W, Coutp), out_itemsize)   # output block (2 bufs)
               + _vmem_bytes((1, W, 3 * Cinp), 2))          # im2col scratch
    fixed = (2 * _vmem_bytes((2 * p, Wp, Cinp), 2)          # halo block (2 bufs)
             + _vmem_bytes((2 * p, W, 3 * Cinp), 2)         # im2col halo rows
             + 2 * _vmem_bytes((3, 3 * Cinp, Coutp), 2)     # weights (2 bufs, const index map)
             + 4 * _vmem_bytes((1, Coutp), 4))              # scale + bias (2 bufs each)
    budget = vmem_limit - (6 << 20)                         # headroom for internal scratch
    TH = max(q, ((budget - fixed) // per_row) // q * q)
    TH = min(TH, _round_up(H, q))                           # never taller than the image
    if B == 1 and H > q:
        # Keep at least 2 grid steps so both v7x TensorCores get work.
        TH = min(TH, _round_up(-(-H // 2), q))
    Ht = _round_up(H, TH)
    nH = Ht // TH
    assert TH % (2 * p) == 0 and TH % 8 == 0, (TH, p)
    halo_stride = TH // (2 * p)                              # halo block index step per H-tile

    # ---- layout glue (single fused XLA relayout pass: transpose + bf16 cast + pads) -------
    # TODO(synk): in a full U2-Net port keep activations NHWC(+channel pad, bf16) between
    # REBNCONV calls; this entry relayout and the exit slice+transpose are full-tensor HBM
    # round trips that should only happen at model boundaries.
    x_nhwc = jnp.transpose(x_nchw, (0, 2, 3, 1)).astype(jnp.bfloat16)
    x_pad = jnp.pad(x_nhwc, ((0, 0), (p, p + (Ht - H)), (p, p), (0, Cinp - Cin)))
    assert x_pad.shape[1] == Ht + 2 * p

    # Weights OIHW -> (kh, kw*Cinp + ci, co): kw folded (kw-major) into the contraction dim.
    w_hwio = jnp.transpose(conv_w_oihw, (2, 3, 1, 0))                     # (3, 3, Cin, Cout)
    w_pad = jnp.pad(w_hwio, ((0, 0), (0, 0), (0, Cinp - Cin), (0, Coutp - Cout)))
    w2 = w_pad.astype(jnp.bfloat16).reshape(3, 3 * Cinp, Coutp)

    # Fold conv bias + BN(eval) into per-channel scale/bias (kept in f32).
    inv_std = 1.0 / jnp.sqrt(bn_var.astype(jnp.float32) + eps)
    scale = bn_gamma.astype(jnp.float32) * inv_std                        # (Cout,)
    bias = (bn_beta.astype(jnp.float32) - bn_mean.astype(jnp.float32) * scale
            + conv_b.astype(jnp.float32) * scale)                         # (Cout,)
    scale2d = jnp.pad(scale, (0, Coutp - Cout)).reshape(1, Coutp)
    bias2d = jnp.pad(bias, (0, Coutp - Cout)).reshape(1, Coutp)

    kernel = functools.partial(_rebnconv_kernel, TH=TH, W=W, Cinp=Cinp, Coutp=Coutp,
                               pad=p, acc_in_out=(out_dtype == jnp.float32))

    out = pl.pallas_call(
        kernel,
        out_shape=jax.ShapeDtypeStruct((B, Ht, W, Coutp), out_dtype),
        grid_spec=pltpu.PrefetchScalarGridSpec(
            num_scalar_prefetch=0,
            grid=(B, nH),
            in_specs=[
                # main rows [ti*TH, ti*TH + TH) of the padded image
                pl.BlockSpec((1, TH, Wp, Cinp), lambda b, ti: (b, ti, 0, 0)),
                # halo rows [ti*TH + TH, ti*TH + TH + 2*dirate) via a 2*dirate-high block grid
                pl.BlockSpec((1, 2 * p, Wp, Cinp),
                             lambda b, ti: (b, (ti + 1) * halo_stride, 0, 0)),
                pl.BlockSpec((3, 3 * Cinp, Coutp), lambda b, ti: (0, 0, 0)),
                pl.BlockSpec((1, Coutp), lambda b, ti: (0, 0)),
                pl.BlockSpec((1, Coutp), lambda b, ti: (0, 0)),
            ],
            out_specs=pl.BlockSpec((1, TH, W, Coutp), lambda b, ti: (b, ti, 0, 0)),
            scratch_shapes=[
                pltpu.VMEM((TH + 2 * p, W, 3 * Cinp), jnp.bfloat16),   # kw-folded im2col LHS
            ],
        ),
        compiler_params=pltpu.CompilerParams(
            dimension_semantics=("parallel", "parallel"),
            vmem_limit_bytes=int(vmem_limit),
        ),
    )(x_pad, x_pad, w2, scale2d, bias2d)

    # Drop padded rows/channels, NHWC -> NCHW.
    out = out[:, :H, :, :Cout]
    return jnp.transpose(out, (0, 3, 1, 2))


def rebnconv_reference(x_nchw, conv_w_oihw, conv_b, bn_gamma, bn_beta, bn_mean, bn_var,
                       *, dirate=1, eps=1e-5):
    """Pure-JAX f32 reference (same semantics as the PyTorch module in eval mode)."""
    y = jax.lax.conv_general_dilated(
        x_nchw, conv_w_oihw,
        window_strides=(1, 1),
        padding=((dirate, dirate), (dirate, dirate)),
        rhs_dilation=(dirate, dirate),
        dimension_numbers=("NCHW", "OIHW", "NCHW"),
    )
    y = y + conv_b.reshape(1, -1, 1, 1)
    inv_std = 1.0 / jnp.sqrt(bn_var + eps)
    y = (y - bn_mean.reshape(1, -1, 1, 1)) * (bn_gamma * inv_std).reshape(1, -1, 1, 1) \
        + bn_beta.reshape(1, -1, 1, 1)
    return jnp.maximum(y, 0.0)


if __name__ == "__main__":
    # Small shapes consistent with REBNCONV(in_ch=4, out_ch=8), batch=2, 16x16.
    B, Cin, Cout, H, W = 2, 4, 8, 16, 16

    key = jax.random.PRNGKey(0)
    kx, kw, kb, kg, kbeta, km, kv = jax.random.split(key, 7)

    x = jax.random.normal(kx, (B, Cin, H, W), dtype=jnp.float32)
    conv_w = jax.random.normal(kw, (Cout, Cin, 3, 3), dtype=jnp.float32) * 0.1
    conv_b = jax.random.normal(kb, (Cout,), dtype=jnp.float32) * 0.1
    bn_gamma = 1.0 + 0.1 * jax.random.normal(kg, (Cout,), dtype=jnp.float32)
    bn_beta = 0.1 * jax.random.normal(kbeta, (Cout,), dtype=jnp.float32)
    bn_mean = 0.1 * jax.random.normal(km, (Cout,), dtype=jnp.float32)
    bn_var = jnp.abs(jax.random.normal(kv, (Cout,), dtype=jnp.float32)) + 0.5

    for dirate in (1, 2):
        out = rebnconv_pallas(x, conv_w, conv_b, bn_gamma, bn_beta, bn_mean, bn_var,
                              dirate=dirate)
        out = jax.block_until_ready(out)
        ref = rebnconv_reference(x, conv_w, conv_b, bn_gamma, bn_beta, bn_mean, bn_var,
                                 dirate=dirate)
        ref = jax.block_until_ready(ref)

        assert out.shape == (B, Cout, H, W)
        max_err = float(jnp.max(jnp.abs(out - ref)))
        # bf16 MXU operands with f32 accumulation -> loosened tolerance vs the f32 reference.
        assert jnp.allclose(out, ref, atol=2e-2, rtol=2e-2), max_err

    print("KERNEL_OK")
</pallas_src>

<mosaic_0001>
module attributes {stable_mosaic.version = 11 : i64} {
  func.func @_rebnconv_kernel(%arg0: i32, %arg1: i32, %arg2: memref<1x16x18x16xbf16, #tpu.memory_space<vmem>>, %arg3: memref<1x2x18x16xbf16, #tpu.memory_space<vmem>>, %arg4: memref<3x48x8xbf16, #tpu.memory_space<vmem>>, %arg5: memref<1x8xf32, #tpu.memory_space<vmem>>, %arg6: memref<1x8xf32, #tpu.memory_space<vmem>>, %arg7: memref<1x16x16x8xf32, #tpu.memory_space<vmem>>, %arg8: memref<18x16x48xbf16, #tpu.memory_space<vmem>>) attributes {dimension_semantics = [#tpu.dimension_semantics<parallel>, #tpu.dimension_semantics<parallel>], iteration_bounds = array<i64: 2, 1>, scalar_prefetch = 0 : i64, scratch_operands = 1 : i64, tpu.core_type = #tpu.core_type<tc>, window_params = [{transform_indices = @transform_0, window_bounds = array<i64: 1, 16, 18, 16>}, {transform_indices = @transform_1, window_bounds = array<i64: 1, 2, 18, 16>}, {pipeline_mode = #tpu.pipeline_mode<synchronous>, transform_indices = @transform_2, window_bounds = array<i64: 3, 48, 8>}, {pipeline_mode = #tpu.pipeline_mode<synchronous>, transform_indices = @transform_3, window_bounds = array<i64: 1, 8>}, {pipeline_mode = #tpu.pipeline_mode<synchronous>, transform_indices = @transform_4, window_bounds = array<i64: 1, 8>}, {transform_indices = @transform_5, window_bounds = array<i64: 1, 16, 16, 8>}]} {
    %c0 = arith.constant 0 : index
    %c0_0 = arith.constant 0 : index
    %c0_1 = arith.constant 0 : index
    %c0_2 = arith.constant 0 : index
    %0 = vector.load %arg2[%c0, %c0_0, %c0_1, %c0_2] : memref<1x16x18x16xbf16, #tpu.memory_space<vmem>>, vector<1x16x16x16xbf16>
    %1 = vector.shape_cast %0 : vector<1x16x16x16xbf16> to vector<16x16x16xbf16>
    %c0_3 = arith.constant 0 : index
    %c0_4 = arith.constant 0 : index
    %c0_5 = arith.constant 0 : index
    %2 = vector.load %arg8[%c0_3, %c0_4, %c0_5] : memref<18x16x48xbf16, #tpu.memory_space<vmem>>, vector<16x16x16xbf16>
    tpu.vector_store %arg8[%c0_3, %c0_4, %c0_5], %1 {strides = array<i32>} : memref<18x16x48xbf16, #tpu.memory_space<vmem>>, vector<16x16x16xbf16>,
    %c0_6 = arith.constant 0 : index
    %c0_7 = arith.constant 0 : index
    %c0_8 = arith.constant 0 : index
    %c0_9 = arith.constant 0 : index
    %3 = vector.load %arg3[%c0_6, %c0_7, %c0_8, %c0_9] : memref<1x2x18x16xbf16, #tpu.memory_space<vmem>>, vector<1x2x16x16xbf16>
    %4 = vector.shape_cast %3 : vector<1x2x16x16xbf16> to vector<2x16x16xbf16>
    %c16 = arith.constant 16 : index
    %c0_10 = arith.constant 0 : index
    %c0_11 = arith.constant 0 : index
    %5 = vector.load %arg8[%c16, %c0_10, %c0_11] : memref<18x16x48xbf16, #tpu.memory_space<vmem>>, vector<2x16x16xbf16>
    tpu.vector_store %arg8[%c16, %c0_10, %c0_11], %4 {strides = array<i32>} : memref<18x16x48xbf16, #tpu.memory_space<vmem>>, vector<2x16x16xbf16>,
    %c0_12 = arith.constant 0 : index
    %c0_13 = arith.constant 0 : index
    %c1 = arith.constant 1 : index
    %c0_14 = arith.constant 0 : index
    %6 = vector.load %arg2[%c0_12, %c0_13, %c1, %c0_14] : memref<1x16x18x16xbf16, #tpu.memory_space<vmem>>, vector<1x16x16x16xbf16>
    %7 = vector.shape_cast %6 : vector<1x16x16x16xbf16> to vector<16x16x16xbf16>
    %c0_15 = arith.constant 0 : index
    %c0_16 = arith.constant 0 : index
    %c16_17 = arith.constant 16 : index
    %8 = vector.load %arg8[%c0_15, %c0_16, %c16_17] : memref<18x16x48xbf16, #tpu.memory_space<vmem>>, vector<16x16x16xbf16>
    tpu.vector_store %arg8[%c0_15, %c0_16, %c16_17], %7 {strides = array<i32>} : memref<18x16x48xbf16, #tpu.memory_space<vmem>>, vector<16x16x16xbf16>,
    %c0_18 = arith.constant 0 : index
    %c0_19 = arith.constant 0 : index
    %c1_20 = arith.constant 1 : index
    %c0_21 = arith.constant 0 : index
    %9 = vector.load %arg3[%c0_18, %c0_19, %c1_20, %c0_21] : memref<1x2x18x16xbf16, #tpu.memory_space<vmem>>, vector<1x2x16x16xbf16>
    %10 = vector.shape_cast %9 : vector<1x2x16x16xbf16> to vector<2x16x16xbf16>
    %c16_22 = arith.constant 16 : index
    %c0_23 = arith.constant 0 : index
    %c16_24 = arith.constant 16 : index
    %11 = vector.load %arg8[%c16_22, %c0_23, %c16_24] : memref<18x16x48xbf16, #tpu.memory_space<vmem>>, vector<2x16x16xbf16>
    tpu.vector_store %arg8[%c16_22, %c0_23, %c16_24], %10 {strides = array<i32>} : memref<18x16x48xbf16, #tpu.memory_space<vmem>>, vector<2x16x16xbf16>,
    %c0_25 = arith.constant 0 : index
    %c0_26 = arith.constant 0 : index
    %c2 = arith.constant 2 : index
    %c0_27 = arith.constant 0 : index
    %12 = vector.load %arg2[%c0_25, %c0_26, %c2, %c0_27] : memref<1x16x18x16xbf16, #tpu.memory_space<vmem>>, vector<1x16x16x16xbf16>
    %13 = vector.shape_cast %12 : vector<1x16x16x16xbf16> to vector<16x16x16xbf16>
    %c0_28 = arith.constant 0 : index
    %c0_29 = arith.constant 0 : index
    %c32 = arith.constant 32 : index
    %14 = vector.load %arg8[%c0_28, %c0_29, %c32] : memref<18x16x48xbf16, #tpu.memory_space<vmem>>, vector<16x16x16xbf16>
    tpu.vector_store %arg8[%c0_28, %c0_29, %c32], %13 {strides = array<i32>} : memref<18x16x48xbf16, #tpu.memory_space<vmem>>, vector<16x16x16xbf16>,
    %c0_30 = arith.constant 0 : index
    %c0_31 = arith.constant 0 : index
    %c2_32 = arith.constant 2 : index
    %c0_33 = arith.constant 0 : index
    %15 = vector.load %arg3[%c0_30, %c0_31, %c2_32, %c0_33] : memref<1x2x18x16xbf16, #tpu.memory_space<vmem>>, vector<1x2x16x16xbf16>
    %16 = vector.shape_cast %15 : vector<1x2x16x16xbf16> to vector<2x16x16xbf16>
    %c16_34 = arith.constant 16 : index
    %c0_35 = arith.constant 0 : index
    %c32_36 = arith.constant 32 : index
    %17 = vector.load %arg8[%c16_34, %c0_35, %c32_36] : memref<18x16x48xbf16, #tpu.memory_space<vmem>>, vector<2x16x16xbf16>
    tpu.vector_store %arg8[%c16_34, %c0_35, %c32_36], %16 {strides = array<i32>} : memref<18x16x48xbf16, #tpu.memory_space<vmem>>, vector<2x16x16xbf16>,
    %c0_37 = arith.constant 0 : index
    %c0_38 = arith.constant 0 : index
    %18 = vector.load %arg5[%c0_37, %c0_38] : memref<1x8xf32, #tpu.memory_space<vmem>>, vector<1x8xf32>
    %19 = vector.shape_cast %18 : vector<1x8xf32> to vector<1x1x8xf32>
    %c0_39 = arith.constant 0 : index
    %c0_40 = arith.constant 0 : index
    %20 = vector.load %arg6[%c0_39, %c0_40] : memref<1x8xf32, #tpu.memory_space<vmem>>, vector<1x8xf32>
    %21 = vector.shape_cast %20 : vector<1x8xf32> to vector<1x1x8xf32>
    %c0_41 = arith.constant 0 : index
    %c0_42 = arith.constant 0 : index
    %c0_43 = arith.constant 0 : index
    %22 = vector.load %arg8[%c0_41, %c0_42, %c0_43] : memref<18x16x48xbf16, #tpu.memory_space<vmem>>, vector<16x16x48xbf16>
    %c0_44 = arith.constant 0 : index
    %c0_45 = arith.constant 0 : index
    %c0_46 = arith.constant 0 : index
    %23 = vector.load %arg4[%c0_44, %c0_45, %c0_46] : memref<3x48x8xbf16, #tpu.memory_space<vmem>>, vector<1x48x8xbf16>
    %24 = vector.shape_cast %23 : vector<1x48x8xbf16> to vector<48x8xbf16>
    %cst = arith.constant dense<0.000000e+00> : vector<16x16x8xf32>
    %25 = tpu.matmul %22, %24, %cst {dimension_numbers = #tpu.dot_dimension_numbers<[2], [0], [0, 1], [1], [0, 0, 0, 1, 1, 1], [], []>} : vector<16x16x48xbf16>, vector<48x8xbf16>, vector<16x16x8xf32> -> vector<16x16x8xf32>
    %c0_47 = arith.constant 0 : index
    %c0_48 = arith.constant 0 : index
    %c0_49 = arith.constant 0 : index
    %c0_50 = arith.constant 0 : index
    %26 = vector.load %arg7[%c0_47, %c0_48, %c0_49, %c0_50] : memref<1x16x16x8xf32, #tpu.memory_space<vmem>>, vector<1x16x16x8xf32>
    %27 = vector.shape_cast %26 : vector<1x16x16x8xf32> to vector<16x16x8xf32>
    %28 = vector.shape_cast %25 : vector<16x16x8xf32> to vector<1x16x16x8xf32>
    tpu.vector_store %arg7[%c0_47, %c0_48, %c0_49, %c0_50], %28 {strides = array<i32>} : memref<1x16x16x8xf32, #tpu.memory_space<vmem>>, vector<1x16x16x8xf32>,
    %c1_51 = arith.constant 1 : index
    %c0_52 = arith.constant 0 : index
    %c0_53 = arith.constant 0 : index
    %29 = vector.load %arg8[%c1_51, %c0_52, %c0_53] : memref<18x16x48xbf16, #tpu.memory_space<vmem>>, vector<16x16x48xbf16>
    %c1_54 = arith.constant 1 : index
    %c0_55 = arith.constant 0 : index
    %c0_56 = arith.constant 0 : index
    %30 = vector.load %arg4[%c1_54, %c0_55, %c0_56] : memref<3x48x8xbf16, #tpu.memory_space<vmem>>, vector<1x48x8xbf16>
    %31 = vector.shape_cast %30 : vector<1x48x8xbf16> to vector<48x8xbf16>
    %cst_57 = arith.constant dense<0.000000e+00> : vector<16x16x8xf32>
    %32 = tpu.matmul %29, %31, %cst_57 {dimension_numbers = #tpu.dot_dimension_numbers<[2], [0], [0, 1], [1], [0, 0, 0, 1, 1, 1], [], []>} : vector<16x16x48xbf16>, vector<48x8xbf16>, vector<16x16x8xf32> -> vector<16x16x8xf32>
    %c0_58 = arith.constant 0 : index
    %c0_59 = arith.constant 0 : index
    %c0_60 = arith.constant 0 : index
    %c0_61 = arith.constant 0 : index
    %33 = vector.load %arg7[%c0_58, %c0_59, %c0_60, %c0_61] : memref<1x16x16x8xf32, #tpu.memory_space<vmem>>, vector<1x16x16x8xf32>
    %34 = vector.shape_cast %33 : vector<1x16x16x8xf32> to vector<16x16x8xf32>
    %35 = arith.addf %34, %32 : vector<16x16x8xf32>
    %c0_62 = arith.constant 0 : index
    %c0_63 = arith.constant 0 : index
    %c0_64 = arith.constant 0 : index
    %c0_65 = arith.constant 0 : index
    %36 = vector.load %arg7[%c0_62, %c0_63, %c0_64, %c0_65] : memref<1x16x16x8xf32, #tpu.memory_space<vmem>>, vector<1x16x16x8xf32>
    %37 = vector.shape_cast %36 : vector<1x16x16x8xf32> to vector<16x16x8xf32>
    %38 = vector.shape_cast %35 : vector<16x16x8xf32> to vector<1x16x16x8xf32>
    tpu.vector_store %arg7[%c0_62, %c0_63, %c0_64, %c0_65], %38 {strides = array<i32>} : memref<1x16x16x8xf32, #tpu.memory_space<vmem>>, vector<1x16x16x8xf32>,
    %c2_66 = arith.constant 2 : index
    %c0_67 = arith.constant 0 : index
    %c0_68 = arith.constant 0 : index
    %39 = vector.load %arg8[%c2_66, %c0_67, %c0_68] : memref<18x16x48xbf16, #tpu.memory_space<vmem>>, vector<16x16x48xbf16>
    %c2_69 = arith.constant 2 : index
    %c0_70 = arith.constant 0 : index
    %c0_71 = arith.constant 0 : index
    %40 = vector.load %arg4[%c2_69, %c0_70, %c0_71] : memref<3x48x8xbf16, #tpu.memory_space<vmem>>, vector<1x48x8xbf16>
    %41 = vector.shape_cast %40 : vector<1x48x8xbf16> to vector<48x8xbf16>
    %cst_72 = arith.constant dense<0.000000e+00> : vector<16x16x8xf32>
    %42 = tpu.matmul %39, %41, %cst_72 {dimension_numbers = #tpu.dot_dimension_numbers<[2], [0], [0, 1], [1], [0, 0, 0, 1, 1, 1], [], []>} : vector<16x16x48xbf16>, vector<48x8xbf16>, vector<16x16x8xf32> -> vector<16x16x8xf32>
    %c0_73 = arith.constant 0 : index
    %c0_74 = arith.constant 0 : index
    %c0_75 = arith.constant 0 : index
    %c0_76 = arith.constant 0 : index
    %43 = vector.load %arg7[%c0_73, %c0_74, %c0_75, %c0_76] : memref<1x16x16x8xf32, #tpu.memory_space<vmem>>, vector<1x16x16x8xf32>
    %44 = vector.shape_cast %43 : vector<1x16x16x8xf32> to vector<16x16x8xf32>
    %45 = arith.addf %44, %42 : vector<16x16x8xf32>
    %46 = vector.broadcast %19 : vector<1x1x8xf32> to vector<16x16x8xf32>
    %47 = arith.mulf %45, %46 : vector<16x16x8xf32>
    %48 = vector.broadcast %21 : vector<1x1x8xf32> to vector<16x16x8xf32>
    %49 = arith.addf %47, %48 : vector<16x16x8xf32>
    %cst_77 = arith.constant 0.000000e+00 : f32
    %50 = vector.broadcast %cst_77 : f32 to vector<16x16x8xf32>
    %51 = arith.maximumf %49, %50 : vector<16x16x8xf32>
    %c0_78 = arith.constant 0 : index
    %c0_79 = arith.constant 0 : index
    %c0_80 = arith.constant 0 : index
    %c0_81 = arith.constant 0 : index
    %52 = vector.load %arg7[%c0_78, %c0_79, %c0_80, %c0_81] : memref<1x16x16x8xf32, #tpu.memory_space<vmem>>, vector<1x16x16x8xf32>
    %53 = vector.shape_cast %52 : vector<1x16x16x8xf32> to vector<16x16x8xf32>
    %54 = vector.shape_cast %51 : vector<16x16x8xf32> to vector<1x16x16x8xf32>
    tpu.vector_store %arg7[%c0_78, %c0_79, %c0_80, %c0_81], %54 {strides = array<i32>} : memref<1x16x16x8xf32, #tpu.memory_space<vmem>>, vector<1x16x16x8xf32>,
    return
  }
  func.func @transform_0(%arg0: i32, %arg1: i32) -> (i32, i32, i32, i32) {
    %c0_i32 = arith.constant 0 : i32
    %c0_i32_0 = arith.constant 0 : i32
    %c0_i32_1 = arith.constant 0 : i32
    return %arg0, %arg1, %c0_i32, %c0_i32_0 : i32, i32, i32, i32
  }
  func.func @transform_1(%arg0: i32, %arg1: i32) -> (i32, i32, i32, i32) {
    %c1_i32 = arith.constant 1 : i32
    %0 = arith.addi %arg1, %c1_i32 : i32
    %c8_i32 = arith.constant 8 : i32
    %1 = arith.muli %0, %c8_i32 : i32
    %c0_i32 = arith.constant 0 : i32
    %c0_i32_0 = arith.constant 0 : i32
    %c0_i32_1 = arith.constant 0 : i32
    return %arg0, %1, %c0_i32, %c0_i32_0 : i32, i32, i32, i32
  }
  func.func @transform_2(%arg0: i32, %arg1: i32) -> (i32, i32, i32) {
    %c0_i32 = arith.constant 0 : i32
    %c0_i32_0 = arith.constant 0 : i32
    %c0_i32_1 = arith.constant 0 : i32
    %c0_i32_2 = arith.constant 0 : i32
    return %c0_i32, %c0_i32_0, %c0_i32_1 : i32, i32, i32
  }
  func.func @transform_3(%arg0: i32, %arg1: i32) -> (i32, i32) {
    %c0_i32 = arith.constant 0 : i32
    %c0_i32_0 = arith.constant 0 : i32
    %c0_i32_1 = arith.constant 0 : i32
    return %c0_i32, %c0_i32_0 : i32, i32
  }
  func.func @transform_4(%arg0: i32, %arg1: i32) -> (i32, i32) {
    %c0_i32 = arith.constant 0 : i32
    %c0_i32_0 = arith.constant 0 : i32
    %c0_i32_1 = arith.constant 0 : i32
    return %c0_i32, %c0_i32_0 : i32, i32
  }
  func.func @transform_5(%arg0: i32, %arg1: i32) -> (i32, i32, i32, i32) {
    %c0_i32 = arith.constant 0 : i32
    %c0_i32_0 = arith.constant 0 : i32
    %c0_i32_1 = arith.constant 0 : i32
    return %arg0, %arg1, %c0_i32, %c0_i32_0 : i32, i32, i32, i32
  }
}

</mosaic_0001>

<bundles_post_ra>
// kernel: tpu_custom_call.1
= control target key start
LH: loop header
LB: loop body
LE: loop exit
PB: predicated region body
PF: predicated region fallthrough
CT: control target
= control target key end

     0   :  { %s3066_s18 = smov 0   ;;  %s3068_s19 = smov 0   ;;  %s3774_s0 = inlined_call_operand.vmem [shape: bf16[2,18,18,16], index: 0, kind: input, shape index: {}]   ;;  %s3775_s1 = inlined_call_operand.vmem [shape: bf16[2,18,18,16], index: 1, kind: input, shape index: {}]   ;;  %s3776_s2 = inlined_call_operand.vmem [shape: bf16[3,48,8], index: 2, kind: input, shape index: {}]   ;;  %s3777_s3 = inlined_call_operand.vmem [shape: f32[1,8], index: 3, kind: input, shape index: {}]   ;;  %s3778_s4 = inlined_call_operand.vmem [shape: f32[1,8], index: 4, kind: input, shape index: {}]   ;;  %s3779_s5 = inlined_call_operand.vmem [shape: f32[2,16,16,8], index: 5, kind: output, shape index: {}]  }
   0x1   :  { %s3070_s20 = smov 0  }
   0x2 LB: > { %s27_s21 = sadd.s32 1, %s3028_s19  ;;  %p2534_p0 = scmp.ge.s32.totalorder %s3032_s20, 1  ;;  %s3032_s20 = sphi %s3070_s20, %s15_s20   ;;  %s3028_s19 = sphi %s3068_s19, %s3781_s19   ;;  %s3024_s18 = sphi %s3066_s18, %s3780_s18  }
   0x3   : > { %p29_p1 = scmp.ge.s32.totalorder %s27_s21, 2  ;;  %p245_p2 = scmp.lt.s32.totalorder %s3032_s20, 3 }
   0x5   : > { %s3783_s21 = smov (%p29_p1, %s27_s21), 0  ;;  %p246_p3 = pnand %p2534_p0, %p245_p2 }
   0x6   : > { %p306_p4 = scmp.lt.s32.totalorder (!%p246_p3), %s3024_s18, 1  ;;  %vm1176_vm0 = vcmask (!%p246_p3), 1046528   ;;  %vm688_vm1 = vsmask.f32 (!%p246_p3), 7424  ;;  %s3034_s26 = smov (!%p246_p3), 32   ;;  %vm476_vm2 = vcmask (!%p246_p3), 130048  }
   0x7   : > { %249 = sbr.rel (%p246_p3) target bundleno = 496 (0x1f0), region = 40  ;;  %s3035_s27 = smov (!%p246_p3), 16   ;;  %vm929_vm3 = vcmask (!%p246_p3), 261248   ;;  %vm1273_vm4 = vcmask (!%p246_p3), 392448   ;;  %vm1368_vm5 = vcmask (!%p246_p3), 392192   ;;  %vm1578_vm6 = vcmask (!%p246_p3), 64512  }
   0xe   : > { %s3785_s18 = smov (!%p306_p4, %s3024_s18), 1 }
   0xf   : > { %s2882_s22 = smul.u32 216, %s3785_s18  ;;  %s2704_s29 = sshll.u32 %s3785_s18, 8 }
  0x10   : > { %s3433_s7 = scalar_lea.vmem %s3779_s5, %s2704_s29 }
  0x11   : > { %s3092_s25 = scalar_lea.vmem %s3774_s0, %s2882_s22  ;;  %s3157_s28 = sadd.s32 192, %s2882_s22 }
  0x12   : > { %v2911_v0 = vld [vmem:[%s3092_s25 + $0x78] sm:$0xfe]   ;;  %v2912_v1 = vld [vmem:[%s3092_s25 + $0x80] ss:$0 sps:$4 sm:$0x11]   ;;  %v2919_v2 = vld [vmem:[%s3092_s25 + $0x84] sm:$0xff]   ;;  %s3212_s6 = scalar_lea.vmem %s3775_s1, %s3157_s28 }
  0x13   : > { %v1207_v3 = vrot.slane %v2911_v0, 1  ;;  %v1208_v4 = vrot.slane %v2912_v1, 1  ;;  %v2913_v5 = vld [vmem:[%s3092_s25 + $0x60] sm:$0xfe]   ;;  %v822_v7 = vshrl.u32 %v2919_v2, 16  ;;  %v824_v11 = vshll.u32 %v2919_v2, 16 }
  0x14   : > { %v2914_v6 = vld [vmem:[%s3092_s25 + $0x68] ss:$0 sps:$4 sm:$0x11]   ;;  %v1201_v9 = vrot.slane %v2913_v5, 1  ;;  %v2917_v18 = vld [vmem:[%s3092_s25 + $0x6c] sm:$0xfe]  }
  0x15   : > { %v1209_v8 = vsel %vm1176_vm0, %v1207_v3, %v1208_v4  ;;  %v2915_v10 = vld [vmem:[%s3092_s25 + $0x84] sm:$0xfe]   ;;  %v1202_v12 = vrot.slane %v2914_v6, 1  ;;  %v2916_v13 = vld [vmem:[%s3092_s25 + $0x8c] ss:$0 sps:$4 sm:$0x11]  }
  0x16   : > { %1245 = vrot.lane.b32.xlu0 %v1209_v8, %s3034_s26  ;;  %v1210_v14 = vrot.slane %v2915_v10, 1  ;;  %v826_v15 = vrot.slane %v824_v11, 1  ;;  %v1211_v17 = vrot.slane %v2916_v13, 1  ;;  %v2918_v19 = vld [vmem:[%s3092_s25 + $0x74] ss:$0 sps:$4 sm:$0x11]  }
  0x17   : > { %v1203_v16 = vsel %vm1176_vm0, %v1201_v9, %v1202_v12  ;;  %v1204_v21 = vrot.slane %v2917_v18, 1  ;;  %v1205_v22 = vrot.slane %v2918_v19, 1  ;;  %v2920_v23 = vld [vmem:[%s3092_s25 + $0x8c] ss:$0 sps:$4 sm:$0x11]   ;;  %v2921_v24 = vld [vmem:[%s3092_s25 + $0x60] sm:$0xff]  }
  0x18   : > { %1241 = vrot.lane.b32.xlu1 %v1203_v16, %s3034_s26  ;;  %v1212_v20 = vsel %vm1176_vm0, %v1210_v14, %v1211_v17  ;;  %v827_v25 = vor.u32 %v826_v15, %v822_v7  ;;  %v829_v27 = vshll.u32 %v2920_v23, 16  ;;  %v2922_v28 = vld [vmem:[%s3092_s25 + $0x68] ss:$0 sps:$4 sm:$0x11]   ;;  %v786_v29 = vshrl.u32 %v2921_v24, 16  ;;  %v2923_v34 = vld [vmem:[%s3092_s25 + $0x6c] sm:$0xff]  }
  0x19   : > { %v1206_v26 = vsel %vm1176_vm0, %v1204_v21, %v1205_v22  ;;  %v788_v30 = vshll.u32 %v2921_v24, 16  ;;  %v793_v33 = vshll.u32 %v2922_v28, 16  ;;  %v2924_v35 = vld [vmem:[%s3092_s25 + $0x74] ss:$0 sps:$4 sm:$0x11]   ;;  %v2925_v36 = vld [vmem:[%s3092_s25] sm:$0xff]  }
  0x1a   : > { %1247 = vrot.lane.b32.xlu0 %v1212_v20, %s3034_s26  ;;  %v831_v31 = vrot.slane %v829_v27, 1  ;;  %v798_v40 = vshrl.u32 %v2923_v34, 16  ;;  %v800_v41 = vshll.u32 %v2923_v34, 16  ;;  %v805_v42 = vshll.u32 %v2924_v35, 16  ;;  %v2927_v47 = vld [vmem:[%s3092_s25 + $0x78] sm:$0xff]   ;;  %v2929_v55 = vld [vmem:[%s3092_s25 + $0xc] sm:$0xff]  }
  0x1b   : > { %v790_v32 = vrot.slane %v788_v30, 1  ;;  %v795_v39 = vrot.slane %v793_v33, 1  ;;  %v2926_v43 = vld [vmem:[%s3092_s25 + $0x8] ss:$0 sps:$4 sm:$0x11]   ;;  %v690_v44 = vshrl.u32 %v2925_v36, 16 }
  0x1c   : > { %1243 = vrot.lane.b32.xlu1 %v1206_v26, %s3034_s26  ;;  %v832_v37 = vsel %vm688_vm1, %v827_v25, %v831_v31  ;;  %v692_v46 = vshll.u32 %v2925_v36, 16  ;;  %v802_v48 = vrot.slane %v800_v41, 1  ;;  %v807_v49 = vrot.slane %v805_v42, 1  ;;  %v2928_v51 = vld [vmem:[%s3092_s25 + $0x80] ss:$0 sps:$4 sm:$0x11]  }
  0x1d   : > { %v791_v38 = vor.u32 %v790_v32, %v786_v29  ;;  %v697_v50 = vshll.u32 %v2926_v43, 16  ;;  %v810_v53 = vshrl.u32 %v2927_v47, 16  ;;  %v812_v54 = vshll.u32 %v2927_v47, 16  ;;  %v2930_v61 = vld [vmem:[%s3092_s25 + $0x14] ss:$0 sps:$4 sm:$0x11]  }
  0x1e   : > { %v694_v52 = vrot.slane %v692_v46, 1  ;;  %v803_v56 = vor.u32 %v802_v48, %v798_v40  ;;  %v817_v58 = vshll.u32 %v2928_v51, 16  ;;  %v702_v62 = vshrl.u32 %v2929_v55, 16  ;;  %v2935_v2 = vld [vmem:[%s3092_s25 + $0x90] sm:$0xff]   ;;  %v2931_v7 = vld [vmem:[%s3092_s25] sm:$0xfe]  }
  0x1f   : > { %v796_v45 = vsel %vm688_vm1, %v791_v38, %v795_v39  ;;  %v699_v57 = vrot.slane %v697_v50, 1  ;;  %v814_v60 = vrot.slane %v812_v54, 1  ;;  %v704_v63 = vshll.u32 %v2929_v55, 16  ;;  %v2932_v8 = vld [vmem:[%s3092_s25 + $0x8] ss:$0 sps:$4 sm:$0x11]  }
  0x20   : > { %903 = vrot.lane.b32.xlu1 %v832_v37, %s3035_s27  ;;  %897 = vrot.lane.b32.xlu0 %v796_v45, %s3035_s27  ;;  %v695_v59 = vor.u32 %v694_v52, %v690_v44  ;;  %v808_v0 = vsel %vm688_vm1, %v803_v56, %v807_v49  ;;  %v819_v1 = vrot.slane %v817_v58, 1  ;;  %v709_v6 = vshll.u32 %v2930_v61, 16  ;;  %v2933_v15 = vld [vmem:[%s3092_s25 + $0xc] sm:$0xfe]   ;;  %v2937_v26 = vld [vmem:[%s3092_s25 + $0x9c] sm:$0xff]  }
  0x21   : > { %v815_v4 = vor.u32 %v814_v60, %v810_v53  ;;  %v706_v5 = vrot.slane %v704_v63, 1  ;;  %v834_v9 = vshrl.u32 %v2935_v2, 16  ;;  %v1177_v13 = vrot.slane %v2931_v7, 1  ;;  %v2934_v16 = vld [vmem:[%s3092_s25 + $0x14] ss:$0 sps:$4 sm:$0x11]  }
  0x22   : > { %v700_v3 = vsel %vm688_vm1, %v695_v59, %v699_v57  ;;  %v711_v12 = vrot.slane %v709_v6, 1  ;;  %v1178_v14 = vrot.slane %v2932_v8, 1  ;;  %v1180_v19 = vrot.slane %v2933_v15, 1  ;;  %v2936_v21 = vld [vmem:[%s3092_s25 + $0x98] ss:$0 sps:$4 sm:$0x11]  }
  0x23   : > { %v820_v10 = vsel %vm688_vm1, %v815_v4, %v819_v1  ;;  %v707_v11 = vor.u32 %v706_v5, %v702_v62  ;;  %v1181_v20 = vrot.slane %v2934_v16, 1  ;;  %v836_v22 = vshll.u32 %v2935_v2, 16  ;;  %v2938_v27 = vld [vmem:[%s3092_s25 + $0xa4] ss:$0 sps:$4 sm:$0x11]   ;;  %v2941_v33 = vld [vmem:[%s3092_s25 + $0x18] sm:$0xff]  }
  0x24   : > { %899 = vrot.lane.b32.xlu0 %v808_v0, %s3035_s27  ;;  %881 = vrot.lane.b32.xlu1 %v700_v3, %s3035_s27  ;;  %v1179_v18 = vsel %vm1176_vm0, %v1177_v13, %v1178_v14  ;;  %v841_v25 = vshll.u32 %v2936_v21, 16  ;;  %v846_v30 = vshrl.u32 %v2937_v26, 16  ;;  %v848_v31 = vshll.u32 %v2937_v26, 16  ;;  %v2939_v32 = vld [vmem:[%s3092_s25 + $0x90] sm:$0xfe]   ;;  %v2945_v45 = vld [vmem:[%s3092_s25 + $0x24] sm:$0xff]  }
  0x25   : > { %v712_v17 = vsel %vm688_vm1, %v707_v11, %v711_v12  ;;  %v1182_v23 = vsel %vm1176_vm0, %v1180_v19, %v1181_v20  ;;  %v838_v24 = vrot.slane %v836_v22, 1  ;;  %v853_v34 = vshll.u32 %v2938_v27, 16  ;;  %v2940_v35 = vld [vmem:[%s3092_s25 + $0x98] ss:$0 sps:$4 sm:$0x11]   ;;  %v2951_v54 = vld [vmem:[%s3092_s25 + $0xa8] sm:$0xff]  }
  0x26   : > { %v843_v29 = vrot.slane %v841_v25, 1  ;;  %v850_v37 = vrot.slane %v848_v31, 1  ;;  %v1213_v38 = vrot.slane %v2939_v32, 1  ;;  %v1214_v40 = vrot.slane %v2940_v35, 1  ;;  %v2943_v48 = vld [vmem:[%s3092_s25 + $0x9c] sm:$0xfe]  }
  0x27   : > { %v839_v28 = vor.u32 %v838_v24, %v834_v9  ;;  %v855_v39 = vrot.slane %v853_v34, 1  ;;  %v2942_v41 = vld [vmem:[%s3092_s25 + $0x20] ss:$0 sps:$4 sm:$0x11]   ;;  %v714_v42 = vshrl.u32 %v2941_v33, 16  ;;  %v716_v44 = vshll.u32 %v2941_v33, 16 }
  0x28   : > { %901 = vrot.lane.b32.xlu0 %v820_v10, %s3035_s27  ;;  %883 = vrot.lane.b32.xlu1 %v712_v17, %s3035_s27  ;;  %v851_v43 = vor.u32 %v850_v37, %v846_v30  ;;  %v1215_v46 = vsel %vm1176_vm0, %v1213_v38, %v1214_v40  ;;  %v721_v47 = vshll.u32 %v2942_v41, 16  ;;  %v2944_v51 = vld [vmem:[%s3092_s25 + $0xa4] ss:$0 sps:$4 sm:$0x11]   ;;  %v1216_v53 = vrot.slane %v2943_v48, 1  ;;  %v2953_v16 = vld [vmem:[%s3092_s25 + $0xb4] sm:$0xff]  }
  0x29   : > { %v844_v36 = vsel %vm688_vm1, %v839_v28, %v843_v29  ;;  %v718_v50 = vrot.slane %v716_v44, 1  ;;  %v1217_v56 = vrot.slane %v2944_v51, 1  ;;  %v2946_v57 = vld [vmem:[%s3092_s25 + $0x2c] ss:$0 sps:$4 sm:$0x11]   ;;  %v726_v58 = vshrl.u32 %v2945_v45, 16 }
  0x2a   : > { %v856_v49 = vsel %vm688_vm1, %v851_v43, %v855_v39  ;;  %v723_v52 = vrot.slane %v721_v47, 1  ;;  %v728_v59 = vshll.u32 %v2945_v45, 16  ;;  %v733_v63 = vshll.u32 %v2946_v57, 16  ;;  %v2947_v0 = vld [vmem:[%s3092_s25 + $0x18] sm:$0xfe]   ;;  %v2957_v31 = vld [vmem:[%s3092_s25 + $0x30] sm:$0xff]  }
  0x2b   : > { %v719_v55 = vor.u32 %v718_v50, %v714_v42  ;;  %v1218_v61 = vsel %vm1176_vm0, %v1216_v53, %v1217_v56  ;;  %v2948_v1 = vld [vmem:[%s3092_s25 + $0x20] ss:$0 sps:$4 sm:$0x11]   ;;  %v858_v2 = vshrl.u32 %v2951_v54, 16  ;;  %v1183_v5 = vrot.slane %v2947_v0, 1  ;;  %v2967_v51 = vld [vmem:[%s3092_s25 + $0x48] sm:$0xff]  }
  0x2c   : > { %1225 = vrot.lane.b32.xlu0 %v1179_v18, %s3034_s26  ;;  %1227 = vrot.lane.b32.xlu1 %v1182_v23, %s3034_s26  ;;  %v730_v62 = vrot.slane %v728_v59, 1  ;;  %v735_v4 = vrot.slane %v733_v63, 1  ;;  %v2949_v6 = vld [vmem:[%s3092_s25 + $0x24] sm:$0xfe]   ;;  %v1184_v7 = vrot.slane %v2948_v1, 1  ;;  %v860_v11 = vshll.u32 %v2951_v54, 16 }
  0x2d   : > { %v724_v60 = vsel %vm688_vm1, %v719_v55, %v723_v52  ;;  %v2950_v8 = vld [vmem:[%s3092_s25 + $0x2c] ss:$0 sps:$4 sm:$0x11]   ;;  %v1186_v10 = vrot.slane %v2949_v6, 1  ;;  %v870_v21 = vshrl.u32 %v2953_v16, 16  ;;  %v872_v22 = vshll.u32 %v2953_v16, 16 }
  0x2e   : > { %v731_v3 = vor.u32 %v730_v62, %v726_v58  ;;  %v1185_v12 = vsel %vm1176_vm0, %v1183_v5, %v1184_v7  ;;  %v1187_v13 = vrot.slane %v2950_v8, 1  ;;  %v2952_v14 = vld [vmem:[%s3092_s25 + $0xb0] ss:$0 sps:$4 sm:$0x11]   ;;  %v862_v15 = vrot.slane %v860_v11, 1  ;;  %v2961_v32 = vld [vmem:[%s3092_s25 + $0x3c] sm:$0xff]  }
  0x2f   : > { %v865_v18 = vshll.u32 %v2952_v14, 16  ;;  %v2954_v19 = vld [vmem:[%s3092_s25 + $0xbc] ss:$0 sps:$4 sm:$0x11]   ;;  %v2955_v25 = vld [vmem:[%s3092_s25 + $0xa8] sm:$0xfe]  }
  0x30   : > { %905 = vrot.lane.b32.xlu0 %v844_v36, %s3035_s27  ;;  %907 = vrot.lane.b32.xlu1 %v856_v49, %s3035_s27  ;;  %v736_v9 = vsel %vm688_vm1, %v731_v3, %v735_v4  ;;  %v1188_v17 = vsel %vm1176_vm0, %v1186_v10, %v1187_v13  ;;  %v863_v20 = vor.u32 %v862_v15, %v858_v2  ;;  %v877_v24 = vshll.u32 %v2954_v19, 16  ;;  %v2956_v27 = vld [vmem:[%s3092_s25 + $0xb0] ss:$0 sps:$4 sm:$0x11]   ;;  %v2959_v41 = vld [vmem:[%s3092_s25 + $0xb4] sm:$0xfe]  }
  0x31   : > { %v867_v23 = vrot.slane %v865_v18, 1  ;;  %v874_v26 = vrot.slane %v872_v22, 1  ;;  %v1219_v30 = vrot.slane %v2955_v25, 1  ;;  %v1220_v34 = vrot.slane %v2956_v27, 1  ;;  %v2969_v54 = vld [vmem:[%s3092_s25 + $0x54] sm:$0xff]   ;;  %v2975_v16 = vld [vmem:[%s3212_s6] sm:$0xff]  }
  0x32   : > { %v879_v29 = vrot.slane %v877_v24, 1  ;;  %v2958_v35 = vld [vmem:[%s3092_s25 + $0x38] ss:$0 sps:$4 sm:$0x11]   ;;  %v738_v36 = vshrl.u32 %v2957_v31, 16  ;;  %v740_v37 = vshll.u32 %v2957_v31, 16 }
  0x33   : > { %v868_v28 = vsel %vm688_vm1, %v863_v20, %v867_v23  ;;  %v875_v33 = vor.u32 %v874_v26, %v870_v21  ;;  %v1221_v39 = vsel %vm1176_vm0, %v1219_v30, %v1220_v34  ;;  %v745_v40 = vshll.u32 %v2958_v35, 16  ;;  %v2960_v42 = vld [vmem:[%s3092_s25 + $0xbc] ss:$0 sps:$4 sm:$0x11]   ;;  %v2963_v57 = vld [vmem:[%s3092_s25 + $0x30] sm:$0xfe]  }
  0x34   : > { %1249 = vrot.lane.b32.xlu0 %v1215_v46, %s3034_s26  ;;  %885 = vrot.lane.b32.xlu1 %v724_v60, %s3035_s27  ;;  %v742_v43 = vrot.slane %v740_v37, 1  ;;  %v750_v44 = vshrl.u32 %v2961_v32, 16  ;;  %v1222_v46 = vrot.slane %v2959_v41, 1  ;;  %v1223_v47 = vrot.slane %v2960_v42, 1  ;;  %v2965_v2 = vld [vmem:[%s3092_s25 + $0x3c] sm:$0xfe]  }
  0x35   : > { %v880_v38 = vsel %vm688_vm1, %v875_v33, %v879_v29  ;;  %v747_v45 = vrot.slane %v745_v40, 1  ;;  %v752_v48 = vshll.u32 %v2961_v32, 16  ;;  %v2962_v50 = vld [vmem:[%s3092_s25 + $0x44] ss:$0 sps:$4 sm:$0x11]   ;;  %v762_v60 = vshrl.u32 %v2967_v51, 16 }
  0x36   : > { %v743_v49 = vor.u32 %v742_v43, %v738_v36  ;;  %v1224_v52 = vsel %vm1176_vm0, %v1222_v46, %v1223_v47  ;;  %v757_v56 = vshll.u32 %v2962_v50, 16  ;;  %v2964_v58 = vld [vmem:[%s3092_s25 + $0x38] ss:$0 sps:$4 sm:$0x11]   ;;  %v1189_v63 = vrot.slane %v2963_v57, 1  ;;  %v2979_v36 = vld [vmem:[%s3092_s25 + $0x84] sm:$0xff]  }
  0x37   : > { %v754_v53 = vrot.slane %v752_v48, 1  ;;  %v1190_v0 = vrot.slane %v2964_v58, 1  ;;  %v774_v1 = vshrl.u32 %v2969_v54, 16  ;;  %v2966_v3 = vld [vmem:[%s3092_s25 + $0x44] ss:$0 sps:$4 sm:$0x11]  }
  0x38   : > { %1251 = vrot.lane.b32.xlu0 %v1218_v61, %s3034_s26  ;;  %887 = vrot.lane.b32.xlu1 %v736_v9, %s3035_s27  ;;  %v748_v55 = vsel %vm688_vm1, %v743_v49, %v747_v45  ;;  %v764_v61 = vshll.u32 %v2967_v51, 16  ;;  %v759_v62 = vrot.slane %v757_v56, 1  ;;  %v1192_v7 = vrot.slane %v2965_v2, 1  ;;  %v2968_v9 = vld [vmem:[%s3092_s25 + $0x50] ss:$0 sps:$4 sm:$0x11]  }
  0x39   : > { %v755_v59 = vor.u32 %v754_v53, %v750_v44  ;;  %v1191_v6 = vsel %vm1176_vm0, %v1189_v63, %v1190_v0  ;;  %v1193_v8 = vrot.slane %v2966_v3, 1  ;;  %v776_v10 = vshll.u32 %v2969_v54, 16  ;;  %v2970_v14 = vld [vmem:[%s3092_s25 + $0x5c] ss:$0 sps:$4 sm:$0x11]   ;;  %488 = vst.msk [vmem:[#allocation2 + $0x58] sm:$0xff] %vm476_vm2, %v2979_v36 }
  0x3a   : > { %v766_v4 = vrot.slane %v764_v61, 1  ;;  %v769_v13 = vshll.u32 %v2968_v9, 16  ;;  %v781_v19 = vshll.u32 %v2970_v14, 16  ;;  %v2971_v20 = vld [vmem:[%s3092_s25 + $0x48] sm:$0xfe]   ;;  %v969_v22 = vshrl.u32 %v2975_v16, 16 }
  0x3b   : > { %v760_v5 = vsel %vm688_vm1, %v755_v59, %v759_v62  ;;  %v1194_v11 = vsel %vm1176_vm0, %v1192_v7, %v1193_v8  ;;  %v778_v15 = vrot.slane %v776_v10, 1  ;;  %v2972_v21 = vld [vmem:[%s3092_s25 + $0x50] ss:$0 sps:$4 sm:$0x11]   ;;  %v1195_v25 = vrot.slane %v2971_v20, 1  ;;  %v2980_v45 = vld [vmem:[%s3092_s25 + $0x60] sm:$0xff]  }
  0x3c   : > { %1229 = vrot.lane.b32.xlu0 %v1185_v12, %s3034_s26  ;;  %1231 = vrot.lane.b32.xlu1 %v1188_v17, %s3034_s26  ;;  %v767_v12 = vor.u32 %v766_v4, %v762_v60  ;;  %v771_v17 = vrot.slane %v769_v13, 1  ;;  %v783_v24 = vrot.slane %v781_v19, 1  ;;  %v2973_v26 = vld [vmem:[%s3092_s25 + $0x54] sm:$0xfe]   ;;  %v1196_v27 = vrot.slane %v2972_v21, 1  ;;  %v2981_v46 = vld [vmem:[%s3776_s2] sm:$0xff]  }
  0x3d   : > { %v779_v18 = vor.u32 %v778_v15, %v774_v1  ;;  %v1198_v30 = vrot.slane %v2973_v26, 1  ;;  %v971_v31 = vshll.u32 %v2975_v16, 16  ;;  %v2976_v34 = vld [vmem:[%s3212_s6 + $0x8] ss:$0 sps:$4 sm:$0x11]   ;;  %485 = vst.msk [vmem:[#allocation2 + $0x40] sm:$0xff] %vm476_vm2, %v2980_v45  ;;  %2876 = vmatprep.subr.bf16.mxu1 %v2981_v46  ;;  %2762 = vmatprep.subr.bf16.mxu0 %v2981_v46 }
  0x3e   : > { %v772_v23 = vsel %vm688_vm1, %v767_v12, %v771_v17  ;;  %v1197_v32 = vsel %vm1176_vm0, %v1195_v25, %v1196_v27  ;;  %v2978_v40 = vld [vmem:[%s3212_s6 + $0x8] ss:$0 sps:$4 sm:$0x11]   ;;  %v2982_v49 = vld [vmem:[%s3212_s6 + $0xc] sm:$0xff]   ;;  %2879 = vmatpush3.bf16.msra.mxu1 %v2981_v46  ;;  %v2987_v57 = vld [vmem:[%s3092_s25] sm:$0xff]   ;;  %2763 = vmatpush3.bf16.msra.mxu0 %v2981_v46 }
  0x3f   : > { %v784_v29 = vsel %vm688_vm1, %v779_v18, %v783_v24  ;;  %v973_v35 = vrot.slane %v971_v31, 1  ;;  %v1313_v44 = vrot.slane %v2978_v40, 1  ;;  %v2983_v50 = vld [vmem:[%s3212_s6 + $0x14] ss:$0 sps:$4 sm:$0x11]   ;;  %v981_v51 = vshrl.u32 %v2982_v49, 16 }
  0x40   : > { %909 = vrot.lane.b32.xlu0 %v868_v28, %s3035_s27  ;;  %911 = vrot.lane.b32.xlu1 %v880_v38, %s3035_s27  ;;  %v2974_v28 = vld [vmem:[%s3092_s25 + $0x5c] ss:$0 sps:$4 sm:$0x11]   ;;  %v976_v38 = vshll.u32 %v2976_v34, 16  ;;  %v988_v53 = vshll.u32 %v2983_v50, 16  ;;  %v2988_v61 = vld [vmem:[%s3776_s2 + $0x8] sm:$0xff]  }
  0x41   : > { %v1199_v33 = vrot.slane %v2974_v28, 1  ;;  %v974_v41 = vor.u32 %v973_v35, %v969_v22  ;;  %v2984_v54 = vld [vmem:[%s3212_s6 + $0xc] sm:$0xfe]   ;;  %v2985_v56 = vld [vmem:[%s3212_s6 + $0x14] ss:$0 sps:$4 sm:$0x11]   ;;  %2877 = vmatprep.subr.bf16.mxu1 %v2988_v61  ;;  %2764 = vmatprep.subr.bf16.mxu0 %v2988_v61 }
  0x42   : > { %v978_v42 = vrot.slane %v976_v38, 1  ;;  %v990_v59 = vrot.slane %v988_v53, 1  ;;  %v1315_v60 = vrot.slane %v2984_v54, 1  ;;  %v1316_v62 = vrot.slane %v2985_v56, 1  ;;  %477 = vst.msk [vmem:[#allocation2] sm:$0xff] %vm476_vm2, %v2987_v57  ;;  %v2989_v63 = vld [vmem:[%s3092_s25 + $0x78] sm:$0xff]   ;;  %2880 = vmatpush3.bf16.msra.mxu1 %v2988_v61  ;;  %2765 = vmatpush3.bf16.msra.mxu0 %v2988_v61 }
  0x43   : > { %v1200_v37 = vsel %vm1176_vm0, %v1198_v30, %v1199_v33  ;;  %487 = vst.msk [vmem:[#allocation2 + $0x50] sm:$0xff] %vm476_vm2, %v2989_v63  ;;  %v2990_v2 = vld [vmem:[%s3092_s25 + $0xc] sm:$0xff]   ;;  %v2994_v7 = vld [vmem:[%s3092_s25 + $0x18] sm:$0xff]   ;;  %v2995_v8 = vld [vmem:[%s3092_s25 + $0x24] sm:$0xff]  }
  0x44   : > { %1253 = vrot.lane.b32.xlu0 %v1221_v39, %s3034_s26  ;;  %889 = vrot.lane.b32.xlu1 %v748_v55, %s3035_s27  ;;  %v2977_v39 = vld [vmem:[%s3212_s6] sm:$0xfe]   ;;  %v979_v47 = vsel %vm688_vm1, %v974_v41, %v978_v42  ;;  %v2986_v55 = vld [vmem:[%s3092_s25 + $0x6c] sm:$0xff]   ;;  %v1317_v1 = vsel %vm1176_vm0, %v1315_v60, %v1316_v62  ;;  %478 = vst.msk [vmem:[#allocation2 + $0x8] sm:$0xff] %vm476_vm2, %v2990_v2  ;;  %479 = vst.msk [vmem:[#allocation2 + $0x10] sm:$0xff] %vm476_vm2, %v2994_v7 }
  0x45   : > { %v1312_v43 = vrot.slane %v2977_v39, 1  ;;  %486 = vst.msk [vmem:[#allocation2 + $0x48] sm:$0xff] %vm476_vm2, %v2986_v55  ;;  %v2991_v3 = vld [vmem:[%s3776_s2 + $0x10] sm:$0xff]   ;;  %v2996_v9 = vld [vmem:[%s3776_s2 + $0x18] sm:$0xff]   ;;  %480 = vst.msk [vmem:[#allocation2 + $0x18] sm:$0xff] %vm476_vm2, %v2995_v8 }
  0x46   : > { %2878 = vmatprep.subr.bf16.mxu1 %v2991_v3  ;;  %2766 = vmatprep.subr.bf16.mxu0 %v2991_v3  ;;  %v2997_v10 = vld [vmem:[%s3092_s25 + $0xa8] sm:$0xff]   ;;  %v3285_v12 = vld [vmem:[%s3776_s2 + $0x30] sm:$0xff]   ;;  %v3002_v14 = vld [vmem:[%s3092_s25 + $0x3c] sm:$0xff]  }
  0x47   : > { %v1314_v48 = vsel %vm1176_vm0, %v1312_v43, %v1313_v44  ;;  %2881 = vmatpush3.bf16.msra.mxu1 %v2991_v3  ;;  %2767 = vmatpush3.bf16.msra.mxu0 %v2991_v3  ;;  %491 = vst.msk [vmem:[#allocation2 + $0x70] sm:$0xff] %vm476_vm2, %v2997_v10  ;;  %v3000_v13 = vld [vmem:[%s3092_s25 + $0x30] sm:$0xff]   ;;  %v3003_v15 = vld [vmem:[%s3092_s25 + $0x48] sm:$0xff]   ;;  %482 = vst.msk [vmem:[#allocation2 + $0x28] sm:$0xff] %vm476_vm2, %v3002_v14 }
  0x48   : > { %1255 = vrot.lane.b32.xlu0 %v1224_v52, %s3034_s26  ;;  %891 = vrot.lane.b32.xlu1 %v760_v5, %s3035_s27  ;;  %v983_v52 = vshll.u32 %v2982_v49, 16  ;;  %v2992_v5 = vld [vmem:[%s3092_s25 + $0x90] sm:$0xff]   ;;  %481 = vst.msk [vmem:[#allocation2 + $0x20] sm:$0xff] %vm476_vm2, %v3000_v13  ;;  %483 = vst.msk [vmem:[#allocation2 + $0x30] sm:$0xff] %vm476_vm2, %v3003_v15  ;;  %v3008_v17 = vld [vmem:[%s3212_s6] sm:$0xff]  }
  0x49   : > { %489 = vst.msk [vmem:[#allocation2 + $0x60] sm:$0xff] %vm476_vm2, %v2992_v5  ;;  %2800 = vmatprep.subr.bf16.mxu1 %v2996_v9  ;;  %2838 = vmatprep.subr.bf16.mxu0 %v3285_v12  ;;  %v3005_v16 = vld [vmem:[%s3092_s25 + $0x54] sm:$0xff]   ;;  %510 = vst.msk [vmem:[#allocation2 + $0x80] sm:$0xff] %vm476_vm2, %v3008_v17  ;;  %v3009_v20 = vld [vmem:[%s3212_s6 + $0xc] sm:$0xff]  }
  0x4a   : > { %v985_v58 = vrot.slane %v983_v52, 1  ;;  %484 = vst.msk [vmem:[#allocation2 + $0x38] sm:$0xff] %vm476_vm2, %v3005_v16  ;;  %511 = vst.msk [vmem:[#allocation2 + $0x88] sm:$0xff] %vm476_vm2, %v3009_v20  ;;  %v3001_v31 = vld [vmem:[%s3776_s2 + $0x20] sm:$0xff]   ;;  %v3006_v35 = vld [vmem:[%s3776_s2 + $0x28] sm:$0xff]  }
  0x4b   : > { %v3004_v40 = vld [vmem:[%s3776_s2 + $0x38] sm:$0xff]   ;;  %v3007_v45 = vld [vmem:[%s3776_s2 + $0x40] sm:$0xff]  }
  0x4c   : > { %1233 = vrot.lane.b32.xlu0 %v1191_v6, %s3034_s26  ;;  %1235 = vrot.lane.b32.xlu1 %v1194_v11, %s3034_s26  ;;  %v986_v0 = vor.u32 %v985_v58, %v981_v51  ;;  %v2993_v6 = vld [vmem:[%s3092_s25 + $0x9c] sm:$0xff]   ;;  %v2998_v11 = vld [vmem:[%s3092_s25 + $0xb4] sm:$0xff]  }
  0x4d   : > { %490 = vst.msk [vmem:[#allocation2 + $0x68] sm:$0xff] %vm476_vm2, %v2993_v6  ;;  %492 = vst.msk [vmem:[#allocation2 + $0x78] sm:$0xff] %vm476_vm2, %v2998_v11 }
  0x4e   : > { %v991_v4 = vsel %vm688_vm1, %v986_v0, %v990_v59 }
  0x50   : > { %893 = vrot.lane.b32.xlu0 %v772_v23, %s3035_s27  ;;  %895 = vrot.lane.b32.xlu1 %v784_v29, %s3035_s27 }
  0x54   : > { %1237 = vrot.lane.b32.xlu0 %v1197_v32, %s3034_s26  ;;  %1239 = vrot.lane.b32.xlu1 %v1200_v37, %s3034_s26 }
  0x58   : > { %992 = vrot.lane.b32.xlu0 %v979_v47, %s3035_s27  ;;  %1318 = vrot.lane.b32.xlu1 %v1314_v48, %s3034_s26 }
  0x5c   : > { %1320 = vrot.lane.b32.xlu1 %v1317_v1, %s3034_s26  ;;  %994 = vrot.lane.b32.xlu0 %v991_v4, %s3035_s27 }
  0x88   : > { %v1246_v18 = vpop.permute.xlu0 %1245 }
  0x8a   : > { %v1242_v19 = vpop.permute.xlu1 %1241 }
  0x8c   : > { %v1248_v21 = vpop.permute.xlu0 %1247 }
  0x8e   : > { %v1244_v22 = vpop.permute.xlu1 %1243 }
  0x92   : > { %v904_v23 = vpop.permute.xlu1 %903  ;;  %v898_v24 = vpop.permute.xlu0 %897 }
  0x93   : > { %941 = vst.msk [vmem:[#allocation2 + $0x58] sm:$0xff] %vm929_vm3, %v904_v23  ;;  %938 = vst.msk [vmem:[#allocation2 + $0x40] sm:$0xff] %vm929_vm3, %v898_v24 }
  0x94   : > { %1285 = vst.msk [vmem:[#allocation2 + $0x58] sm:$0xff] %vm1273_vm4, %v1248_v21  ;;  %1282 = vst.msk [vmem:[#allocation2 + $0x40] sm:$0xff] %vm1273_vm4, %v1242_v19 }
  0x96   : > { %v900_v25 = vpop.permute.xlu0 %899  ;;  %v882_v26 = vpop.permute.xlu1 %881 }
  0x97   : > { %939 = vst.msk [vmem:[#allocation2 + $0x48] sm:$0xff] %vm929_vm3, %v900_v25  ;;  %930 = vst.msk [vmem:[#allocation2] sm:$0xff] %vm929_vm3, %v882_v26 }
  0x98   : > { %1283 = vst.msk [vmem:[#allocation2 + $0x48] sm:$0xff] %vm1273_vm4, %v1244_v22 }
  0x9a   : > { %v902_v27 = vpop.permute.xlu0 %901  ;;  %v884_v29 = vpop.permute.xlu1 %883 }
  0x9b   : > { %v3309_v28 = vld [vmem:[#allocation2 + $0x40] sm:$0xff]  ;;  %940 = vst.msk [vmem:[#allocation2 + $0x50] sm:$0xff] %vm929_vm3, %v902_v27  ;;  %931 = vst.msk [vmem:[#allocation2 + $0x8] sm:$0xff] %vm929_vm3, %v884_v29  ;;  %v3339_v42 = vld [vmem:[#allocation2 + $0x58] sm:$0xff] }
  0x9c   : > { %2784 = vmatprep.mubr.msk.bf16.mxu1 %vm1368_vm5, %v3309_v28  ;;  %1284 = vst.msk [vmem:[#allocation2 + $0x50] sm:$0xff] %vm1273_vm4, %v1246_v18 }
  0x9e   : > { %v1226_v30 = vpop.permute.xlu0 %1225  ;;  %v1228_v32 = vpop.permute.xlu1 %1227 }
  0x9f   : > { %1274 = vst.msk [vmem:[#allocation2] sm:$0xff] %vm1273_vm4, %v1226_v30  ;;  %v3320_v33 = vld [vmem:[#allocation2 + $0x48] sm:$0xff]  ;;  %1275 = vst.msk [vmem:[#allocation2 + $0x8] sm:$0xff] %vm1273_vm4, %v1228_v32 }
  0xa0   : > { %2785 = vmatmul.mubr.msk.bf16.vlgmr.msra.gmra.mrb[0].mxu1 %vm1368_vm5, %v3320_v33 }
  0xa1   : > { %2801 = vmatpush3.bf16.msra.mxu1 %v2996_v9 }
  0xa2   : > { %v906_v34 = vpop.permute.xlu0 %905  ;;  %2802 = vmatprep.subr.bf16.mxu1 %v3001_v31  ;;  %v908_v37 = vpop.permute.xlu1 %907 }
  0xa3   : > { %942 = vst.msk [vmem:[#allocation2 + $0x60] sm:$0xff] %vm929_vm3, %v906_v34  ;;  %v3329_v36 = vld [vmem:[#allocation2 + $0x50] sm:$0xff]  ;;  %943 = vst.msk [vmem:[#allocation2 + $0x68] sm:$0xff] %vm929_vm3, %v908_v37 }
  0xa4   : > { %2788 = vmatprep.mubr.msk.bf16.mxu1 %vm1368_vm5, %v3329_v36 }
  0xa5   : > { %2803 = vmatpush3.bf16.msra.mxu1 %v3001_v31 }
  0xa6   : > { %v1250_v38 = vpop.permute.xlu0 %1249  ;;  %v1328_v39 = vld [vmem:[#allocation2] sm:$0xff]  ;;  %2804 = vmatprep.subr.bf16.mxu1 %v3006_v35  ;;  %v1329_v41 = vld [vmem:[#allocation2 + $0x8] sm:$0xff]  ;;  %v886_v43 = vpop.permute.xlu1 %885 }
  0xa7   : > { %1286 = vst.msk [vmem:[#allocation2 + $0x60] sm:$0xff] %vm1273_vm4, %v1250_v38  ;;  %2768 = vmatprep.mubr.msk.bf16.mxu0 %vm1368_vm5, %v1328_v39 }
  0xa8   : > { %2769 = vmatmul.mubr.msk.bf16.vlgmr.msra.gmra.mrb[0].mxu0 %vm1368_vm5, %v1329_v41  ;;  %2789 = vmatmul.mubr.msk.bf16.gmra.mrb[4].mxu1 %vm1368_vm5, %v3339_v42  ;;  %932 = vst.msk [vmem:[#allocation2 + $0x10] sm:$0xff] %vm929_vm3, %v886_v43 }
  0xa9   : > { %2839 = vmatpush3.bf16.msra.mxu0 %v3285_v12  ;;  %2805 = vmatpush3.bf16.msra.mxu1 %v3006_v35 }
  0xaa   : > { %v1252_v44 = vpop.permute.xlu0 %1251  ;;  %2840 = vmatprep.subr.bf16.mxu0 %v3004_v40  ;;  %v888_v46 = vpop.permute.xlu1 %887 }
  0xab   : > { %1287 = vst.msk [vmem:[#allocation2 + $0x68] sm:$0xff] %vm1273_vm4, %v1252_v44 }
  0xac   : > { %933 = vst.msk [vmem:[#allocation2 + $0x18] sm:$0xff] %vm929_vm3, %v888_v46 }
  0xad   : > { %2841 = vmatpush3.bf16.msra.mxu0 %v3004_v40 }
  0xae   : > { %v3350_v47 = vld [vmem:[#allocation2 + $0x60] sm:$0xff]  ;;  %2842 = vmatprep.subr.bf16.mxu0 %v3007_v45  ;;  %v1230_v48 = vpop.permute.xlu0 %1229  ;;  %v1232_v49 = vpop.permute.xlu1 %1231 }
  0xaf   : > { %2792 = vmatprep.mubr.msk.bf16.mxu1 %vm1368_vm5, %v3350_v47  ;;  %1276 = vst.msk [vmem:[#allocation2 + $0x10] sm:$0xff] %vm1273_vm4, %v1230_v48  ;;  %1277 = vst.msk [vmem:[#allocation2 + $0x18] sm:$0xff] %vm1273_vm4, %v1232_v49 }
  0xb1   : > { %2843 = vmatpush3.bf16.msra.mxu0 %v3007_v45 }
  0xb2   : > { %v3356_v50 = vld [vmem:[#allocation2 + $0x68] sm:$0xff]  ;;  %v910_v51 = vpop.permute.xlu0 %909  ;;  %v912_v53 = vpop.permute.xlu1 %911 }
  0xb3   : > { %2793 = vmatmul.mubr.msk.bf16.gmra.mrb[8].mxu1 %vm1368_vm5, %v3356_v50  ;;  %944 = vst.msk [vmem:[#allocation2 + $0x70] sm:$0xff] %vm929_vm3, %v910_v51  ;;  %945 = vst.msk [vmem:[#allocation2 + $0x78] sm:$0xff] %vm929_vm3, %v912_v53 }
  0xb6   : > { %v1330_v52 = vld [vmem:[#allocation2 + $0x10] sm:$0xff]  ;;  %v1254_v54 = vpop.permute.xlu0 %1253  ;;  %v1331_v55 = vld [vmem:[#allocation2 + $0x18] sm:$0xff]  ;;  %v890_v56 = vpop.permute.xlu1 %889 }
  0xb7   : > { %2772 = vmatprep.mubr.msk.bf16.mxu0 %vm1368_vm5, %v1330_v52  ;;  %1288 = vst.msk [vmem:[#allocation2 + $0x70] sm:$0xff] %vm1273_vm4, %v1254_v54 }
  0xb8   : > { %2773 = vmatmul.mubr.msk.bf16.gmra.mrb[4].mxu0 %vm1368_vm5, %v1331_v55  ;;  %934 = vst.msk [vmem:[#allocation2 + $0x20] sm:$0xff] %vm929_vm3, %v890_v56 }
  0xba   : > { %v1256_v57 = vpop.permute.xlu0 %1255  ;;  %v892_v58 = vpop.permute.xlu1 %891 }
  0xbb   : > { %1289 = vst.msk [vmem:[#allocation2 + $0x78] sm:$0xff] %vm1273_vm4, %v1256_v57 }
  0xbc   : > { %935 = vst.msk [vmem:[#allocation2 + $0x28] sm:$0xff] %vm929_vm3, %v892_v58 }
  0xbe   : > { %v1234_v59 = vpop.permute.xlu0 %1233  ;;  %v1342_v60 = vld [vmem:[#allocation2 + $0x70] sm:$0xff]  ;;  %v1236_v61 = vpop.permute.xlu1 %1235 }
  0xbf   : > { %1278 = vst.msk [vmem:[#allocation2 + $0x20] sm:$0xff] %vm1273_vm4, %v1234_v59  ;;  %2796 = vmatprep.mubr.msk.bf16.mxu1 %vm1368_vm5, %v1342_v60  ;;  %1279 = vst.msk [vmem:[#allocation2 + $0x28] sm:$0xff] %vm1273_vm4, %v1236_v61 }
  0xc2   : > { %v1343_v62 = vld [vmem:[#allocation2 + $0x78] sm:$0xff]  ;;  %v894_v63 = vpop.permute.xlu0 %893  ;;  %v896_v1 = vpop.permute.xlu1 %895 }
  0xc3   : > { %2797 = vmatmul.mubr.msk.bf16.gmra.mrb[12].mxu1 %vm1368_vm5, %v1343_v62  ;;  %936 = vst.msk [vmem:[#allocation2 + $0x30] sm:$0xff] %vm929_vm3, %v894_v63  ;;  %937 = vst.msk [vmem:[#allocation2 + $0x38] sm:$0xff] %vm929_vm3, %v896_v1 }
  0xc4   : > { %2806 = vmatprep.mubr.msk.bf16.mxu1 %vm1368_vm5, %v1329_v41 }
  0xc6   : > { %v1332_v0 = vld [vmem:[#allocation2 + $0x20] sm:$0xff]  ;;  %v1238_v2 = vpop.permute.xlu0 %1237  ;;  %v1333_v3 = vld [vmem:[#allocation2 + $0x28] sm:$0xff]  ;;  %v1240_v4 = vpop.permute.xlu1 %1239 }
  0xc7   : > { %2776 = vmatprep.mubr.msk.bf16.mxu0 %vm1368_vm5, %v1332_v0  ;;  %1280 = vst.msk [vmem:[#allocation2 + $0x30] sm:$0xff] %vm1273_vm4, %v1238_v2  ;;  %1281 = vst.msk [vmem:[#allocation2 + $0x38] sm:$0xff] %vm1273_vm4, %v1240_v4 }
  0xc8   : > { %2777 = vmatmul.mubr.msk.bf16.gmra.mrb[8].mxu0 %vm1368_vm5, %v1333_v3 }
  0xca   : > { %v993_v5 = vpop.permute.xlu0 %992  ;;  %v1319_v6 = vpop.permute.xlu1 %1318 }
  0xcb   : > { %2807 = vmatmul.mubr.msk.bf16.vlgmr.msra.gmra.mrb[16].mxu1 %vm1368_vm5, %v1330_v52  ;;  %998 = vst.msk [vmem:[#allocation2 + $0x80] sm:$0xff] %vm929_vm3, %v993_v5 }
  0xcc   : > { %2810 = vmatprep.mubr.msk.bf16.mxu1 %vm1368_vm5, %v1331_v55  ;;  %1324 = vst.msk [vmem:[#allocation2 + $0x80] sm:$0xff] %vm1273_vm4, %v1319_v6 }
  0xce   : > { %v1334_v7 = vld [vmem:[#allocation2 + $0x30] sm:$0xff]  ;;  %v1335_v8 = vld [vmem:[#allocation2 + $0x38] sm:$0xff]  ;;  %v1321_v9 = vpop.permute.xlu1 %1320  ;;  %v995_v10 = vpop.permute.xlu0 %994 }
  0xcf   : > { %2780 = vmatprep.mubr.msk.bf16.mxu0 %vm1368_vm5, %v1334_v7  ;;  %999 = vst.msk [vmem:[#allocation2 + $0x88] sm:$0xff] %vm929_vm3, %v995_v10 }
  0xd0   : > { %2781 = vmatmul.mubr.msk.bf16.gmra.mrb[12].mxu0 %vm1368_vm5, %v1335_v8  ;;  %1325 = vst.msk [vmem:[#allocation2 + $0x88] sm:$0xff] %vm1273_vm4, %v1321_v9 }
  0xd1   : > { %2844 = vmatprep.mubr.msk.bf16.mxu0 %vm1368_vm5, %v1330_v52 }
  0xd3   : > { %2811 = vmatmul.mubr.msk.bf16.gmra.mrb[20].mxu1 %vm1368_vm5, %v1332_v0  ;;  %v1627_v11 = vld [vmem:[#allocation2 + $0x80] sm:$0xff] }
  0xd4   : > { %2814 = vmatprep.mubr.msk.bf16.mxu1 %vm1368_vm5, %v1333_v3 }
  0xd7   : > { %v1974_v12 = vld [vmem:[#allocation2 + $0x88] sm:$0xff] }
  0xd8   : > { %2845 = vmatmul.mubr.msk.bf16.vlgmr.msra.gmra.mrb[16].mxu0 %vm1368_vm5, %v1331_v55 }
  0xd9   : > { %2848 = vmatprep.mubr.msk.bf16.mxu0 %vm1368_vm5, %v1332_v0 }
  0xdb   : > { %2815 = vmatmul.mubr.msk.bf16.gmra.mrb[24].mxu1 %vm1368_vm5, %v1334_v7 }
  0xdc   : > { %2818 = vmatprep.mubr.msk.bf16.mxu1 %vm1368_vm5, %v1335_v8 }
  0xe0   : > { %2849 = vmatmul.mubr.msk.bf16.gmra.mrb[20].mxu0 %vm1368_vm5, %v1333_v3 }
  0xe1   : > { %2852 = vmatprep.mubr.msk.bf16.mxu0 %vm1368_vm5, %v1334_v7  ;;  %v3527_v7 = vld [vmem:[%s3777_s3] ss:$0 sm:$0xff] }
  0xe3   : > { %2819 = vmatmul.mubr.msk.bf16.gmra.mrb[28].mxu1 %vm1368_vm5, %v3309_v28 }
  0xe4   : > { %2822 = vmatprep.mubr.msk.bf16.mxu1 %vm1368_vm5, %v3320_v33 }
  0xe8   : > { %2853 = vmatmul.mubr.msk.bf16.gmra.mrb[24].mxu0 %vm1368_vm5, %v1335_v8 }
  0xe9   : > { %2856 = vmatprep.mubr.msk.bf16.mxu0 %vm1368_vm5, %v3309_v28 }
  0xeb   : > { %2823 = vmatmul.mubr.msk.bf16.gmra.mrb[32].mxu1 %vm1368_vm5, %v3329_v36 }
  0xec   : > { %2826 = vmatprep.mubr.msk.bf16.mxu1 %vm1368_vm5, %v3339_v42 }
  0xf0   : > { %2857 = vmatmul.mubr.msk.bf16.gmra.mrb[28].mxu0 %vm1368_vm5, %v3320_v33 }
  0xf1   : > { %2860 = vmatprep.mubr.msk.bf16.mxu0 %vm1368_vm5, %v3329_v36 }
  0xf3   : > { %2827 = vmatmul.mubr.msk.bf16.gmra.mrb[36].mxu1 %vm1368_vm5, %v3350_v47 }
  0xf4   : > { %2830 = vmatprep.mubr.msk.bf16.mxu1 %vm1368_vm5, %v3356_v50 }
  0xf8   : > { %2861 = vmatmul.mubr.msk.bf16.gmra.mrb[32].mxu0 %vm1368_vm5, %v3339_v42 }
  0xf9   : > { %2864 = vmatprep.mubr.msk.bf16.mxu0 %vm1368_vm5, %v3350_v47 }
  0xfb   : > { %2831 = vmatmul.mubr.msk.bf16.gmra.mrb[40].mxu1 %vm1368_vm5, %v1342_v60 }
  0xfc   : > { %2834 = vmatprep.mubr.msk.bf16.mxu1 %vm1368_vm5, %v1343_v62 }
 0x100   : > { %2865 = vmatmul.mubr.msk.bf16.gmra.mrb[36].mxu0 %vm1368_vm5, %v3356_v50 }
 0x101   : > { %2868 = vmatprep.mubr.msk.bf16.mxu0 %vm1368_vm5, %v1342_v60 }
 0x103   : > { %2835 = vmatmul.mubr.msk.bf16.gmra.mrb[44].mxu1 %vm1368_vm5, %v1627_v11 }
 0x108   : > { %2869 = vmatmul.mubr.msk.bf16.gmra.mrb[40].mxu0 %vm1368_vm5, %v1343_v62 }
 0x109   : > { %2872 = vmatprep.mubr.msk.bf16.mxu0 %vm1368_vm5, %v1627_v11 }
 0x110   : > { %2873 = vmatmul.mubr.msk.bf16.gmra.mrb[44].mxu0 %vm1368_vm5, %v1974_v12 }
 0x173   : > { %v2786_v13 = vpop.f32.mrb[0].mxu1 }
 0x174   : > { %1597 = vst.msk [vmem:[%s3433_s7 + $0x90] sm:$0xff] %vm1578_vm6, %v2786_v13  ;;  %v1515_v14 = vpop.f32.mrb[1].mxu1 }
 0x175   : > { %1595 = vst.msk [vmem:[%s3433_s7 + $0x80] sm:$0xff] %vm1578_vm6, %v1515_v14  ;;  %v2787_v15 = vpop.f32.mrb[2].mxu1 }
 0x176   : > { %1598 = vst.msk [vmem:[%s3433_s7 + $0x98] sm:$0xff] %vm1578_vm6, %v2787_v15  ;;  %v1518_v16 = vpop.f32.mrb[3].mxu1 }
 0x177   : > { %1596 = vst.msk [vmem:[%s3433_s7 + $0x88] sm:$0xff] %vm1578_vm6, %v1518_v16 }
 0x17b   : > { %v2770_v17 = vpop.f32.mrb[0].mxu0  ;;  %v2790_v18 = vpop.f32.mrb[4].mxu1 }
 0x17c   : > { %1581 = vst.msk [vmem:[%s3433_s7 + $0x10] sm:$0xff] %vm1578_vm6, %v2770_v17  ;;  %1601 = vst.msk [vmem:[%s3433_s7 + $0xb0] sm:$0xff] %vm1578_vm6, %v2790_v18  ;;  %v1451_v19 = vpop.f32.mrb[1].mxu0  ;;  %v1531_v20 = vpop.f32.mrb[5].mxu1 }
 0x17d   : > { %1579 = vst.msk [vmem:[%s3433_s7] sm:$0xff] %vm1578_vm6, %v1451_v19  ;;  %1599 = vst.msk [vmem:[%s3433_s7 + $0xa0] sm:$0xff] %vm1578_vm6, %v1531_v20  ;;  %v2771_v21 = vpop.f32.mrb[2].mxu0  ;;  %v2791_v22 = vpop.f32.mrb[6].mxu1  ;;  %v3536_v19 = vld [vmem:[%s3778_s4] ss:$0 sm:$0xff] }
 0x17e   : > { %1582 = vst.msk [vmem:[%s3433_s7 + $0x18] sm:$0xff] %vm1578_vm6, %v2771_v21  ;;  %1602 = vst.msk [vmem:[%s3433_s7 + $0xb8] sm:$0xff] %vm1578_vm6, %v2791_v22  ;;  %v1454_v23 = vpop.f32.mrb[3].mxu0  ;;  %v1534_v24 = vpop.f32.mrb[7].mxu1 }
 0x17f   : > { %1580 = vst.msk [vmem:[%s3433_s7 + $0x8] sm:$0xff] %vm1578_vm6, %v1454_v23  ;;  %1600 = vst.msk [vmem:[%s3433_s7 + $0xa8] sm:$0xff] %vm1578_vm6, %v1534_v24 }
 0x183   : > { %v1864_v39 = vld [vmem:[%s3433_s7 + $0x10] sm:$0xff] }
 0x184   : > { %v1862_v43 = vld [vmem:[%s3433_s7] sm:$0xff] }
 0x185   : > { %v1865_v47 = vld [vmem:[%s3433_s7 + $0x18] sm:$0xff] }
 0x186   : > { %v2794_v25 = vpop.f32.mrb[8].mxu1  ;;  %v1863_v51 = vld [vmem:[%s3433_s7 + $0x8] sm:$0xff] }
 0x187   : > { %1605 = vst.msk [vmem:[%s3433_s7 + $0xd0] sm:$0xff] %vm1578_vm6, %v2794_v25  ;;  %v1547_v26 = vpop.f32.mrb[9].mxu1 }
 0x188   : > { %1603 = vst.msk [vmem:[%s3433_s7 + $0xc0] sm:$0xff] %vm1578_vm6, %v1547_v26  ;;  %v2795_v27 = vpop.f32.mrb[10].mxu1 }
 0x189   : > { %1606 = vst.msk [vmem:[%s3433_s7 + $0xd8] sm:$0xff] %vm1578_vm6, %v2795_v27  ;;  %v1550_v28 = vpop.f32.mrb[11].mxu1 }
 0x18a   : > { %1604 = vst.msk [vmem:[%s3433_s7 + $0xc8] sm:$0xff] %vm1578_vm6, %v1550_v28 }
 0x18b   : > { %v2774_v29 = vpop.f32.mrb[4].mxu0 }
 0x18c   : > { %1585 = vst.msk [vmem:[%s3433_s7 + $0x30] sm:$0xff] %vm1578_vm6, %v2774_v29  ;;  %v1467_v30 = vpop.f32.mrb[5].mxu0 }
 0x18d   : > { %1583 = vst.msk [vmem:[%s3433_s7 + $0x20] sm:$0xff] %vm1578_vm6, %v1467_v30  ;;  %v2775_v31 = vpop.f32.mrb[6].mxu0 }
 0x18e   : > { %1586 = vst.msk [vmem:[%s3433_s7 + $0x38] sm:$0xff] %vm1578_vm6, %v2775_v31  ;;  %v1470_v32 = vpop.f32.mrb[7].mxu0 }
 0x18f   : > { %1584 = vst.msk [vmem:[%s3433_s7 + $0x28] sm:$0xff] %vm1578_vm6, %v1470_v32 }
 0x193   : > { %v1868_v54 = vld [vmem:[%s3433_s7 + $0x30] sm:$0xff] }
 0x194   : > { %v1866_v58 = vld [vmem:[%s3433_s7 + $0x20] sm:$0xff] }
 0x195   : > { %v1869_v62 = vld [vmem:[%s3433_s7 + $0x38] sm:$0xff] }
 0x196   : > { %v2798_v33 = vpop.f32.mrb[12].mxu1  ;;  %v1867_v2 = vld [vmem:[%s3433_s7 + $0x28] sm:$0xff] }
 0x197   : > { %1609 = vst.msk [vmem:[%s3433_s7 + $0xf0] sm:$0xff] %vm1578_vm6, %v2798_v33  ;;  %v1563_v34 = vpop.f32.mrb[13].mxu1 }
 0x198   : > { %1607 = vst.msk [vmem:[%s3433_s7 + $0xe0] sm:$0xff] %vm1578_vm6, %v1563_v34  ;;  %v2799_v35 = vpop.f32.mrb[14].mxu1 }
 0x199   : > { %1610 = vst.msk [vmem:[%s3433_s7 + $0xf8] sm:$0xff] %vm1578_vm6, %v2799_v35  ;;  %v1566_v36 = vpop.f32.mrb[15].mxu1 }
 0x19a   : > { %1608 = vst.msk [vmem:[%s3433_s7 + $0xe8] sm:$0xff] %vm1578_vm6, %v1566_v36 }
 0x19b   : > { %v2778_v37 = vpop.f32.mrb[8].mxu0 }
 0x19c   : > { %1589 = vst.msk [vmem:[%s3433_s7 + $0x50] sm:$0xff] %vm1578_vm6, %v2778_v37  ;;  %v1483_v40 = vpop.f32.mrb[9].mxu0 }
 0x19d   : > { %1587 = vst.msk [vmem:[%s3433_s7 + $0x40] sm:$0xff] %vm1578_vm6, %v1483_v40  ;;  %v2779_v44 = vpop.f32.mrb[10].mxu0 }
 0x19e   : > { %v2808_v38 = vpop.f32.mrb[16].mxu1  ;;  %1590 = vst.msk [vmem:[%s3433_s7 + $0x58] sm:$0xff] %vm1578_vm6, %v2779_v44  ;;  %v1486_v48 = vpop.f32.mrb[11].mxu0 }
 0x19f   : > { %v1896_v41 = vadd.f32 %v2808_v38, %v1864_v39  ;;  %v1735_v42 = vpop.f32.mrb[17].mxu1  ;;  %1588 = vst.msk [vmem:[%s3433_s7 + $0x48] sm:$0xff] %vm1578_vm6, %v1486_v48 }
 0x1a0   : > { %v1894_v45 = vadd.f32 %v1862_v43, %v1735_v42  ;;  %v2809_v46 = vpop.f32.mrb[18].mxu1 }
 0x1a1   : > { %1928 = vst.msk [vmem:[%s3433_s7 + $0x10] sm:$0xff] %vm1578_vm6, %v1896_v41  ;;  %v1897_v49 = vadd.f32 %v2809_v46, %v1865_v47  ;;  %v1738_v50 = vpop.f32.mrb[19].mxu1 }
 0x1a2   : > { %1926 = vst.msk [vmem:[%s3433_s7] sm:$0xff] %vm1578_vm6, %v1894_v45  ;;  %v1895_v52 = vadd.f32 %v1863_v51, %v1738_v50 }
 0x1a3   : > { %1929 = vst.msk [vmem:[%s3433_s7 + $0x18] sm:$0xff] %vm1578_vm6, %v1897_v49  ;;  %v2782_v55 = vpop.f32.mrb[12].mxu0  ;;  %v1872_v6 = vld [vmem:[%s3433_s7 + $0x50] sm:$0xff] }
 0x1a4   : > { %1927 = vst.msk [vmem:[%s3433_s7 + $0x8] sm:$0xff] %vm1578_vm6, %v1895_v52  ;;  %1593 = vst.msk [vmem:[%s3433_s7 + $0x70] sm:$0xff] %vm1578_vm6, %v2782_v55  ;;  %v1499_v59 = vpop.f32.mrb[13].mxu0  ;;  %v1870_v12 = vld [vmem:[%s3433_s7 + $0x40] sm:$0xff] }
 0x1a5   : > { %1591 = vst.msk [vmem:[%s3433_s7 + $0x60] sm:$0xff] %vm1578_vm6, %v1499_v59  ;;  %v2783_v63 = vpop.f32.mrb[14].mxu0  ;;  %v1873_v18 = vld [vmem:[%s3433_s7 + $0x58] sm:$0xff] }
 0x1a6   : > { %v2812_v53 = vpop.f32.mrb[20].mxu1  ;;  %1594 = vst.msk [vmem:[%s3433_s7 + $0x78] sm:$0xff] %vm1578_vm6, %v2783_v63  ;;  %v1502_v3 = vpop.f32.mrb[15].mxu0  ;;  %v1871_v25 = vld [vmem:[%s3433_s7 + $0x48] sm:$0xff] }
 0x1a7   : > { %v1900_v56 = vadd.f32 %v2812_v53, %v1868_v54  ;;  %v1751_v57 = vpop.f32.mrb[21].mxu1  ;;  %1592 = vst.msk [vmem:[%s3433_s7 + $0x68] sm:$0xff] %vm1578_vm6, %v1502_v3 }
 0x1a8   : > { %v1898_v60 = vadd.f32 %v1866_v58, %v1751_v57  ;;  %v2813_v61 = vpop.f32.mrb[22].mxu1  ;;  %v2211_v9 = vld [vmem:[%s3433_s7 + $0x10] sm:$0xff] }
 0x1a9   : > { %1932 = vst.msk [vmem:[%s3433_s7 + $0x30] sm:$0xff] %vm1578_vm6, %v1900_v56  ;;  %v1901_v0 = vadd.f32 %v2813_v61, %v1869_v62  ;;  %v1754_v1 = vpop.f32.mrb[23].mxu1  ;;  %v2209_v15 = vld [vmem:[%s3433_s7] sm:$0xff] }
 0x1aa   : > { %1930 = vst.msk [vmem:[%s3433_s7 + $0x20] sm:$0xff] %vm1578_vm6, %v1898_v60  ;;  %v1899_v4 = vadd.f32 %v1867_v2, %v1754_v1  ;;  %v2212_v22 = vld [vmem:[%s3433_s7 + $0x18] sm:$0xff] }
 0x1ab   : > { %1933 = vst.msk [vmem:[%s3433_s7 + $0x38] sm:$0xff] %vm1578_vm6, %v1901_v0  ;;  %v2846_v8 = vpop.f32.mrb[16].mxu0  ;;  %v2210_v29 = vld [vmem:[%s3433_s7 + $0x8] sm:$0xff]  ;;  %v1876_v40 = vld [vmem:[%s3433_s7 + $0x70] sm:$0xff] }
 0x1ac   : > { %1931 = vst.msk [vmem:[%s3433_s7 + $0x28] sm:$0xff] %vm1578_vm6, %v1899_v4  ;;  %v2243_v13 = vadd.f32 %v2846_v8, %v2211_v9  ;;  %v2082_v14 = vpop.f32.mrb[17].mxu0  ;;  %v1874_v47 = vld [vmem:[%s3433_s7 + $0x60] sm:$0xff] }
 0x1ad   : > { %v2241_v20 = vadd.f32 %v2209_v15, %v2082_v14  ;;  %v2847_v21 = vpop.f32.mrb[18].mxu0  ;;  %v1877_v54 = vld [vmem:[%s3433_s7 + $0x78] sm:$0xff] }
 0x1ae   : > { %v2816_v5 = vpop.f32.mrb[24].mxu1  ;;  %v2281_v26 = vmul.f32 %v3527_v7, %v2243_v13  ;;  %v2244_v27 = vadd.f32 %v2847_v21, %v2212_v22  ;;  %v2085_v28 = vpop.f32.mrb[19].mxu0  ;;  %v1875_v61 = vld [vmem:[%s3433_s7 + $0x68] sm:$0xff]  ;;  %v1880_v13 = vld [vmem:[%s3433_s7 + $0x90] sm:$0xff]  ;;  %v1878_v21 = vld [vmem:[%s3433_s7 + $0x80] sm:$0xff] }
 0x1af   : > { %v1904_v10 = vadd.f32 %v2816_v5, %v1872_v6  ;;  %v1767_v11 = vpop.f32.mrb[25].mxu1  ;;  %v2279_v31 = vmul.f32 %v3527_v7, %v2241_v20  ;;  %v2242_v32 = vadd.f32 %v2210_v29, %v2085_v28  ;;  %v1881_v28 = vld [vmem:[%s3433_s7 + $0x98] sm:$0xff] }
 0x1b0   : > { %v1902_v16 = vadd.f32 %v1870_v12, %v1767_v11  ;;  %v2817_v17 = vpop.f32.mrb[26].mxu1  ;;  %v2319_v33 = vadd.f32 %v3536_v19, %v2281_v26  ;;  %v2282_v34 = vmul.f32 %v3527_v7, %v2244_v27  ;;  %v2215_v44 = vld [vmem:[%s3433_s7 + $0x30] sm:$0xff] }
 0x1b1   : > { %1936 = vst.msk [vmem:[%s3433_s7 + $0x50] sm:$0xff] %vm1578_vm6, %v1904_v10  ;;  %v1905_v23 = vadd.f32 %v2817_v17, %v1873_v18  ;;  %v1770_v24 = vpop.f32.mrb[27].mxu1  ;;  %v2317_v35 = vadd.f32 %v3536_v19, %v2279_v31  ;;  %v2280_v36 = vmul.f32 %v3527_v7, %v2242_v32  ;;  %v2213_v51 = vld [vmem:[%s3433_s7 + $0x20] sm:$0xff] }
 0x1b2   : > { %1934 = vst.msk [vmem:[%s3433_s7 + $0x40] sm:$0xff] %vm1578_vm6, %v1902_v16  ;;  %v1903_v30 = vadd.f32 %v1871_v25, %v1770_v24  ;;  %v2351_v37 = vmax.f32 %v2319_v33, 0.0  ;;  %v2320_v38 = vadd.f32 %v3536_v19, %v2282_v34  ;;  %v2216_v58 = vld [vmem:[%s3433_s7 + $0x38] sm:$0xff] }
 0x1b3   : > { %1937 = vst.msk [vmem:[%s3433_s7 + $0x58] sm:$0xff] %vm1578_vm6, %v1905_v23  ;;  %v2349_v41 = vmax.f32 %v2317_v35, 0.0  ;;  %v2318_v42 = vadd.f32 %v3536_v19, %v2280_v36  ;;  %v2850_v43 = vpop.f32.mrb[20].mxu0  ;;  %v2214_v1 = vld [vmem:[%s3433_s7 + $0x28] sm:$0xff] }
 0x1b4   : > { %1935 = vst.msk [vmem:[%s3433_s7 + $0x48] sm:$0xff] %vm1578_vm6, %v1903_v30  ;;  %2383 = vst.msk [vmem:[%s3433_s7 + $0x10] sm:$0xff] %vm1578_vm6, %v2351_v37  ;;  %v2352_v48 = vmax.f32 %v2320_v38, 0.0  ;;  %v2247_v49 = vadd.f32 %v2850_v43, %v2215_v44  ;;  %v2098_v50 = vpop.f32.mrb[21].mxu0  ;;  %v1879_v35 = vld [vmem:[%s3433_s7 + $0x88] sm:$0xff] }
 0x1b5   : > { %2381 = vst.msk [vmem:[%s3433_s7] sm:$0xff] %vm1578_vm6, %v2349_v41  ;;  %v2350_v55 = vmax.f32 %v2318_v42, 0.0  ;;  %v2245_v56 = vadd.f32 %v2213_v51, %v2098_v50  ;;  %v2851_v57 = vpop.f32.mrb[22].mxu0  ;;  %v1884_v50 = vld [vmem:[%s3433_s7 + $0xb0] sm:$0xff] }
 0x1b6   : > { %v2820_v39 = vpop.f32.mrb[28].mxu1  ;;  %2384 = vst.msk [vmem:[%s3433_s7 + $0x18] sm:$0xff] %vm1578_vm6, %v2352_v48  ;;  %v2285_v62 = vmul.f32 %v3527_v7, %v2247_v49  ;;  %v2248_v63 = vadd.f32 %v2851_v57, %v2216_v58  ;;  %v2101_v0 = vpop.f32.mrb[23].mxu0  ;;  %v1882_v57 = vld [vmem:[%s3433_s7 + $0xa0] sm:$0xff] }
 0x1b7   : > { %v1908_v45 = vadd.f32 %v2820_v39, %v1876_v40  ;;  %v1783_v46 = vpop.f32.mrb[29].mxu1  ;;  %2382 = vst.msk [vmem:[%s3433_s7 + $0x8] sm:$0xff] %vm1578_vm6, %v2350_v55  ;;  %v2283_v3 = vmul.f32 %v3527_v7, %v2245_v56  ;;  %v2246_v4 = vadd.f32 %v2214_v1, %v2101_v0  ;;  %v1885_v0 = vld [vmem:[%s3433_s7 + $0xb8] sm:$0xff] }
 0x1b8   : > { %v1906_v52 = vadd.f32 %v1874_v47, %v1783_v46  ;;  %v2821_v53 = vpop.f32.mrb[30].mxu1  ;;  %v2323_v5 = vadd.f32 %v3536_v19, %v2285_v62  ;;  %v2286_v6 = vmul.f32 %v3527_v7, %v2248_v63  ;;  %v2219_v17 = vld [vmem:[%s3433_s7 + $0x50] sm:$0xff] }
 0x1b9   : > { %1940 = vst.msk [vmem:[%s3433_s7 + $0x70] sm:$0xff] %vm1578_vm6, %v1908_v45  ;;  %v1909_v59 = vadd.f32 %v2821_v53, %v1877_v54  ;;  %v1786_v60 = vpop.f32.mrb[31].mxu1  ;;  %v2321_v8 = vadd.f32 %v3536_v19, %v2283_v3  ;;  %v2284_v9 = vmul.f32 %v3527_v7, %v2246_v4  ;;  %v2217_v25 = vld [vmem:[%s3433_s7 + $0x40] sm:$0xff] }
 0x1ba   : > { %1938 = vst.msk [vmem:[%s3433_s7 + $0x60] sm:$0xff] %vm1578_vm6, %v1906_v52  ;;  %v1907_v2 = vadd.f32 %v1875_v61, %v1786_v60  ;;  %v2355_v10 = vmax.f32 %v2323_v5, 0.0  ;;  %v2324_v11 = vadd.f32 %v3536_v19, %v2286_v6  ;;  %v2220_v32 = vld [vmem:[%s3433_s7 + $0x58] sm:$0xff] }
 0x1bb   : > { %1941 = vst.msk [vmem:[%s3433_s7 + $0x78] sm:$0xff] %vm1578_vm6, %v1909_v59  ;;  %v2353_v14 = vmax.f32 %v2321_v8, 0.0  ;;  %v2322_v15 = vadd.f32 %v3536_v19, %v2284_v9  ;;  %v2854_v16 = vpop.f32.mrb[24].mxu0  ;;  %v2218_v39 = vld [vmem:[%s3433_s7 + $0x48] sm:$0xff] }
 0x1bc   : > { %1939 = vst.msk [vmem:[%s3433_s7 + $0x68] sm:$0xff] %vm1578_vm6, %v1907_v2  ;;  %2387 = vst.msk [vmem:[%s3433_s7 + $0x30] sm:$0xff] %vm1578_vm6, %v2355_v10  ;;  %v2356_v22 = vmax.f32 %v2324_v11, 0.0  ;;  %v2251_v23 = vadd.f32 %v2854_v16, %v2219_v17  ;;  %v2114_v24 = vpop.f32.mrb[25].mxu0  ;;  %v1883_v8 = vld [vmem:[%s3433_s7 + $0xa8] sm:$0xff] }
 0x1bd   : > { %2385 = vst.msk [vmem:[%s3433_s7 + $0x20] sm:$0xff] %vm1578_vm6, %v2353_v14  ;;  %v2354_v29 = vmax.f32 %v2322_v15, 0.0  ;;  %v2249_v30 = vadd.f32 %v2217_v25, %v2114_v24  ;;  %v2855_v31 = vpop.f32.mrb[26].mxu0  ;;  %v1888_v24 = vld [vmem:[%s3433_s7 + $0xd0] sm:$0xff] }
 0x1be   : > { %v2824_v12 = vpop.f32.mrb[32].mxu1  ;;  %2388 = vst.msk [vmem:[%s3433_s7 + $0x38] sm:$0xff] %vm1578_vm6, %v2356_v22  ;;  %v2289_v36 = vmul.f32 %v3527_v7, %v2251_v23  ;;  %v2252_v37 = vadd.f32 %v2855_v31, %v2220_v32  ;;  %v2117_v38 = vpop.f32.mrb[27].mxu0  ;;  %v1886_v31 = vld [vmem:[%s3433_s7 + $0xc0] sm:$0xff] }
 0x1bf   : > { %v1912_v18 = vadd.f32 %v2824_v12, %v1880_v13  ;;  %v1799_v20 = vpop.f32.mrb[33].mxu1  ;;  %2386 = vst.msk [vmem:[%s3433_s7 + $0x28] sm:$0xff] %vm1578_vm6, %v2354_v29  ;;  %v2287_v41 = vmul.f32 %v3527_v7, %v2249_v30  ;;  %v2250_v42 = vadd.f32 %v2218_v39, %v2117_v38  ;;  %v1889_v38 = vld [vmem:[%s3433_s7 + $0xd8] sm:$0xff] }
 0x1c0   : > { %v1910_v26 = vadd.f32 %v1878_v21, %v1799_v20  ;;  %v2825_v27 = vpop.f32.mrb[34].mxu1  ;;  %v2327_v43 = vadd.f32 %v3536_v19, %v2289_v36  ;;  %v2290_v44 = vmul.f32 %v3527_v7, %v2252_v37  ;;  %v2223_v54 = vld [vmem:[%s3433_s7 + $0x70] sm:$0xff] }
 0x1c1   : > { %1944 = vst.msk [vmem:[%s3433_s7 + $0x90] sm:$0xff] %vm1578_vm6, %v1912_v18  ;;  %v1913_v33 = vadd.f32 %v2825_v27, %v1881_v28  ;;  %v1802_v34 = vpop.f32.mrb[35].mxu1  ;;  %v2325_v45 = vadd.f32 %v3536_v19, %v2287_v41  ;;  %v2288_v46 = vmul.f32 %v3527_v7, %v2250_v42  ;;  %v2221_v61 = vld [vmem:[%s3433_s7 + $0x60] sm:$0xff] }
 0x1c2   : > { %1942 = vst.msk [vmem:[%s3433_s7 + $0x80] sm:$0xff] %vm1578_vm6, %v1910_v26  ;;  %v1911_v40 = vadd.f32 %v1879_v35, %v1802_v34  ;;  %v2359_v47 = vmax.f32 %v2327_v43, 0.0  ;;  %v2328_v48 = vadd.f32 %v3536_v19, %v2290_v44  ;;  %v2224_v4 = vld [vmem:[%s3433_s7 + $0x78] sm:$0xff] }
 0x1c3   : > { %1945 = vst.msk [vmem:[%s3433_s7 + $0x98] sm:$0xff] %vm1578_vm6, %v1913_v33  ;;  %v2357_v51 = vmax.f32 %v2325_v45, 0.0  ;;  %v2326_v52 = vadd.f32 %v3536_v19, %v2288_v46  ;;  %v2858_v53 = vpop.f32.mrb[28].mxu0  ;;  %v2222_v12 = vld [vmem:[%s3433_s7 + $0x68] sm:$0xff] }
 0x1c4   : > { %1943 = vst.msk [vmem:[%s3433_s7 + $0x88] sm:$0xff] %vm1578_vm6, %v1911_v40  ;;  %2391 = vst.msk [vmem:[%s3433_s7 + $0x50] sm:$0xff] %vm1578_vm6, %v2359_v47  ;;  %v2360_v58 = vmax.f32 %v2328_v48, 0.0  ;;  %v2255_v59 = vadd.f32 %v2858_v53, %v2223_v54  ;;  %v2130_v60 = vpop.f32.mrb[29].mxu0  ;;  %v1887_v45 = vld [vmem:[%s3433_s7 + $0xc8] sm:$0xff] }
 0x1c5   : > { %2389 = vst.msk [vmem:[%s3433_s7 + $0x40] sm:$0xff] %vm1578_vm6, %v2357_v51  ;;  %v2358_v1 = vmax.f32 %v2326_v52, 0.0  ;;  %v2253_v2 = vadd.f32 %v2221_v61, %v2130_v60  ;;  %v2859_v3 = vpop.f32.mrb[30].mxu0  ;;  %v1892_v60 = vld [vmem:[%s3433_s7 + $0xf0] sm:$0xff] }
 0x1c6   : > { %v2828_v49 = vpop.f32.mrb[36].mxu1  ;;  %2392 = vst.msk [vmem:[%s3433_s7 + $0x58] sm:$0xff] %vm1578_vm6, %v2360_v58  ;;  %v2293_v9 = vmul.f32 %v3527_v7, %v2255_v59  ;;  %v2256_v10 = vadd.f32 %v2859_v3, %v2224_v4  ;;  %v2133_v11 = vpop.f32.mrb[31].mxu0  ;;  %v1890_v3 = vld [vmem:[%s3433_s7 + $0xe0] sm:$0xff] }
 0x1c7   : > { %v1916_v55 = vadd.f32 %v2828_v49, %v1884_v50  ;;  %v1815_v56 = vpop.f32.mrb[37].mxu1  ;;  %2390 = vst.msk [vmem:[%s3433_s7 + $0x48] sm:$0xff] %vm1578_vm6, %v2358_v1  ;;  %v2291_v14 = vmul.f32 %v3527_v7, %v2253_v2  ;;  %v2254_v15 = vadd.f32 %v2222_v12, %v2133_v11  ;;  %v1893_v11 = vld [vmem:[%s3433_s7 + $0xf8] sm:$0xff] }
 0x1c8   : > { %v1914_v62 = vadd.f32 %v1882_v57, %v1815_v56  ;;  %v2829_v63 = vpop.f32.mrb[38].mxu1  ;;  %v2331_v16 = vadd.f32 %v3536_v19, %v2293_v9  ;;  %v2294_v17 = vmul.f32 %v3527_v7, %v2256_v10  ;;  %v2227_v28 = vld [vmem:[%s3433_s7 + $0x90] sm:$0xff] }
 0x1c9   : > { %1948 = vst.msk [vmem:[%s3433_s7 + $0xb0] sm:$0xff] %vm1578_vm6, %v1916_v55  ;;  %v1917_v5 = vadd.f32 %v2829_v63, %v1885_v0  ;;  %v1818_v6 = vpop.f32.mrb[39].mxu1  ;;  %v2329_v18 = vadd.f32 %v3536_v19, %v2291_v14  ;;  %v2292_v20 = vmul.f32 %v3527_v7, %v2254_v15  ;;  %v2225_v35 = vld [vmem:[%s3433_s7 + $0x80] sm:$0xff] }
 0x1ca   : > { %1946 = vst.msk [vmem:[%s3433_s7 + $0xa0] sm:$0xff] %vm1578_vm6, %v1914_v62  ;;  %v1915_v13 = vadd.f32 %v1883_v8, %v1818_v6  ;;  %v2363_v21 = vmax.f32 %v2331_v16, 0.0  ;;  %v2332_v22 = vadd.f32 %v3536_v19, %v2294_v17  ;;  %v2228_v42 = vld [vmem:[%s3433_s7 + $0x98] sm:$0xff] }
 0x1cb   : > { %1949 = vst.msk [vmem:[%s3433_s7 + $0xb8] sm:$0xff] %vm1578_vm6, %v1917_v5  ;;  %v2361_v25 = vmax.f32 %v2329_v18, 0.0  ;;  %v2330_v26 = vadd.f32 %v3536_v19, %v2292_v20  ;;  %v2862_v27 = vpop.f32.mrb[32].mxu0  ;;  %v2226_v49 = vld [vmem:[%s3433_s7 + $0x88] sm:$0xff] }
 0x1cc   : > { %1947 = vst.msk [vmem:[%s3433_s7 + $0xa8] sm:$0xff] %vm1578_vm6, %v1915_v13  ;;  %2395 = vst.msk [vmem:[%s3433_s7 + $0x70] sm:$0xff] %vm1578_vm6, %v2363_v21  ;;  %v2364_v32 = vmax.f32 %v2332_v22, 0.0  ;;  %v2259_v33 = vadd.f32 %v2862_v27, %v2227_v28  ;;  %v2146_v34 = vpop.f32.mrb[33].mxu0  ;;  %v1891_v18 = vld [vmem:[%s3433_s7 + $0xe8] sm:$0xff] }
 0x1cd   : > { %2393 = vst.msk [vmem:[%s3433_s7 + $0x60] sm:$0xff] %vm1578_vm6, %v2361_v25  ;;  %v2362_v39 = vmax.f32 %v2330_v26, 0.0  ;;  %v2257_v40 = vadd.f32 %v2225_v35, %v2146_v34  ;;  %v2863_v41 = vpop.f32.mrb[34].mxu0 }
 0x1ce   : > { %v2832_v23 = vpop.f32.mrb[40].mxu1  ;;  %2396 = vst.msk [vmem:[%s3433_s7 + $0x78] sm:$0xff] %vm1578_vm6, %v2364_v32  ;;  %v2297_v46 = vmul.f32 %v3527_v7, %v2259_v33  ;;  %v2260_v47 = vadd.f32 %v2863_v41, %v2228_v42  ;;  %v2149_v48 = vpop.f32.mrb[35].mxu0 }
 0x1cf   : > { %v1920_v29 = vadd.f32 %v2832_v23, %v1888_v24  ;;  %v1831_v30 = vpop.f32.mrb[41].mxu1  ;;  %2394 = vst.msk [vmem:[%s3433_s7 + $0x68] sm:$0xff] %vm1578_vm6, %v2362_v39  ;;  %v2295_v51 = vmul.f32 %v3527_v7, %v2257_v40  ;;  %v2258_v52 = vadd.f32 %v2226_v49, %v2149_v48 }
 0x1d0   : > { %v1918_v36 = vadd.f32 %v1886_v31, %v1831_v30  ;;  %v2833_v37 = vpop.f32.mrb[42].mxu1  ;;  %v2335_v53 = vadd.f32 %v3536_v19, %v2297_v46  ;;  %v2298_v54 = vmul.f32 %v3527_v7, %v2260_v47  ;;  %v2231_v0 = vld [vmem:[%s3433_s7 + $0xb0] sm:$0xff] }
 0x1d1   : > { %1952 = vst.msk [vmem:[%s3433_s7 + $0xd0] sm:$0xff] %vm1578_vm6, %v1920_v29  ;;  %v1921_v43 = vadd.f32 %v2833_v37, %v1889_v38  ;;  %v1834_v44 = vpop.f32.mrb[43].mxu1  ;;  %v2333_v55 = vadd.f32 %v3536_v19, %v2295_v51  ;;  %v2296_v56 = vmul.f32 %v3527_v7, %v2258_v52  ;;  %v2229_v8 = vld [vmem:[%s3433_s7 + $0xa0] sm:$0xff] }
 0x1d2   : > { %1950 = vst.msk [vmem:[%s3433_s7 + $0xc0] sm:$0xff] %vm1578_vm6, %v1918_v36  ;;  %v1919_v50 = vadd.f32 %v1887_v45, %v1834_v44  ;;  %v2367_v57 = vmax.f32 %v2335_v53, 0.0  ;;  %v2336_v58 = vadd.f32 %v3536_v19, %v2298_v54  ;;  %v2232_v15 = vld [vmem:[%s3433_s7 + $0xb8] sm:$0xff] }
 0x1d3   : > { %1953 = vst.msk [vmem:[%s3433_s7 + $0xd8] sm:$0xff] %vm1578_vm6, %v1921_v43  ;;  %v2365_v61 = vmax.f32 %v2333_v55, 0.0  ;;  %v2334_v62 = vadd.f32 %v3536_v19, %v2296_v56  ;;  %v2866_v63 = vpop.f32.mrb[36].mxu0  ;;  %v2230_v23 = vld [vmem:[%s3433_s7 + $0xa8] sm:$0xff] }
 0x1d4   : > { %1951 = vst.msk [vmem:[%s3433_s7 + $0xc8] sm:$0xff] %vm1578_vm6, %v1919_v50  ;;  %2399 = vst.msk [vmem:[%s3433_s7 + $0x90] sm:$0xff] %vm1578_vm6, %v2367_v57  ;;  %v2368_v4 = vmax.f32 %v2336_v58, 0.0  ;;  %v2263_v5 = vadd.f32 %v2866_v63, %v2231_v0  ;;  %v2162_v6 = vpop.f32.mrb[37].mxu0 }
 0x1d5   : > { %2397 = vst.msk [vmem:[%s3433_s7 + $0x80] sm:$0xff] %vm1578_vm6, %v2365_v61  ;;  %v2366_v12 = vmax.f32 %v2334_v62, 0.0  ;;  %v2261_v13 = vadd.f32 %v2229_v8, %v2162_v6  ;;  %v2867_v14 = vpop.f32.mrb[38].mxu0 }
 0x1d6   : > { %v2836_v59 = vpop.f32.mrb[44].mxu1  ;;  %2400 = vst.msk [vmem:[%s3433_s7 + $0x98] sm:$0xff] %vm1578_vm6, %v2368_v4  ;;  %v2301_v20 = vmul.f32 %v3527_v7, %v2263_v5  ;;  %v2264_v21 = vadd.f32 %v2867_v14, %v2232_v15  ;;  %v2165_v22 = vpop.f32.mrb[39].mxu0 }
 0x1d7   : > { %v1924_v1 = vadd.f32 %v2836_v59, %v1892_v60  ;;  %v1847_v2 = vpop.f32.mrb[45].mxu1  ;;  %2398 = vst.msk [vmem:[%s3433_s7 + $0x88] sm:$0xff] %vm1578_vm6, %v2366_v12  ;;  %v2299_v25 = vmul.f32 %v3527_v7, %v2261_v13  ;;  %v2262_v26 = vadd.f32 %v2230_v23, %v2165_v22 }
 0x1d8   : > { %v1922_v9 = vadd.f32 %v1890_v3, %v1847_v2  ;;  %v2837_v10 = vpop.f32.mrb[46].mxu1  ;;  %v2339_v27 = vadd.f32 %v3536_v19, %v2301_v20  ;;  %v2302_v28 = vmul.f32 %v3527_v7, %v2264_v21  ;;  %v2235_v36 = vld [vmem:[%s3433_s7 + $0xd0] sm:$0xff] }
 0x1d9   : > { %1956 = vst.msk [vmem:[%s3433_s7 + $0xf0] sm:$0xff] %vm1578_vm6, %v1924_v1  ;;  %v1925_v16 = vadd.f32 %v2837_v10, %v1893_v11  ;;  %v1850_v17 = vpop.f32.mrb[47].mxu1  ;;  %v2337_v29 = vadd.f32 %v3536_v19, %v2299_v25  ;;  %v2300_v30 = vmul.f32 %v3527_v7, %v2262_v26  ;;  %v2233_v40 = vld [vmem:[%s3433_s7 + $0xc0] sm:$0xff] }
 0x1da   : > { %1954 = vst.msk [vmem:[%s3433_s7 + $0xe0] sm:$0xff] %vm1578_vm6, %v1922_v9  ;;  %v1923_v24 = vadd.f32 %v1891_v18, %v1850_v17  ;;  %v2371_v31 = vmax.f32 %v2339_v27, 0.0  ;;  %v2340_v32 = vadd.f32 %v3536_v19, %v2302_v28  ;;  %v2236_v44 = vld [vmem:[%s3433_s7 + $0xd8] sm:$0xff] }
 0x1db   : > { %1957 = vst.msk [vmem:[%s3433_s7 + $0xf8] sm:$0xff] %vm1578_vm6, %v1925_v16  ;;  %v2369_v33 = vmax.f32 %v2337_v29, 0.0  ;;  %v2338_v34 = vadd.f32 %v3536_v19, %v2300_v30  ;;  %v2870_v35 = vpop.f32.mrb[40].mxu0  ;;  %v2234_v48 = vld [vmem:[%s3433_s7 + $0xc8] sm:$0xff] }
 0x1dc   : > { %1955 = vst.msk [vmem:[%s3433_s7 + $0xe8] sm:$0xff] %vm1578_vm6, %v1923_v24  ;;  %2403 = vst.msk [vmem:[%s3433_s7 + $0xb0] sm:$0xff] %vm1578_vm6, %v2371_v31  ;;  %v2372_v37 = vmax.f32 %v2340_v32, 0.0  ;;  %v2267_v38 = vadd.f32 %v2870_v35, %v2235_v36  ;;  %v2178_v39 = vpop.f32.mrb[41].mxu0 }
 0x1dd   : > { %2401 = vst.msk [vmem:[%s3433_s7 + $0xa0] sm:$0xff] %vm1578_vm6, %v2369_v33  ;;  %v2370_v41 = vmax.f32 %v2338_v34, 0.0  ;;  %v2265_v42 = vadd.f32 %v2233_v40, %v2178_v39  ;;  %v2871_v43 = vpop.f32.mrb[42].mxu0 }
 0x1de   : > { %2404 = vst.msk [vmem:[%s3433_s7 + $0xb8] sm:$0xff] %vm1578_vm6, %v2372_v37  ;;  %v2305_v45 = vmul.f32 %v3527_v7, %v2267_v38  ;;  %v2268_v46 = vadd.f32 %v2871_v43, %v2236_v44  ;;  %v2181_v47 = vpop.f32.mrb[43].mxu0 }
 0x1df   : > { %2402 = vst.msk [vmem:[%s3433_s7 + $0xa8] sm:$0xff] %vm1578_vm6, %v2370_v41  ;;  %v2303_v49 = vmul.f32 %v3527_v7, %v2265_v42  ;;  %v2266_v50 = vadd.f32 %v2234_v48, %v2181_v47 }
 0x1e0   : > { %v2343_v51 = vadd.f32 %v3536_v19, %v2305_v45  ;;  %v2306_v52 = vmul.f32 %v3527_v7, %v2268_v46  ;;  %v2239_v60 = vld [vmem:[%s3433_s7 + $0xf0] sm:$0xff] }
 0x1e1   : > { %v2341_v53 = vadd.f32 %v3536_v19, %v2303_v49  ;;  %v2304_v54 = vmul.f32 %v3527_v7, %v2266_v50  ;;  %v2237_v0 = vld [vmem:[%s3433_s7 + $0xe0] sm:$0xff] }
 0x1e2   : > { %v2375_v55 = vmax.f32 %v2343_v51, 0.0  ;;  %v2344_v56 = vadd.f32 %v3536_v19, %v2306_v52  ;;  %v2240_v4 = vld [vmem:[%s3433_s7 + $0xf8] sm:$0xff] }
 0x1e3   : > { %v2373_v57 = vmax.f32 %v2341_v53, 0.0  ;;  %v2342_v58 = vadd.f32 %v3536_v19, %v2304_v54  ;;  %v2874_v59 = vpop.f32.mrb[44].mxu0  ;;  %v2238_v9 = vld [vmem:[%s3433_s7 + $0xe8] sm:$0xff] }
 0x1e4   : > { %2407 = vst.msk [vmem:[%s3433_s7 + $0xd0] sm:$0xff] %vm1578_vm6, %v2375_v55  ;;  %v2376_v61 = vmax.f32 %v2344_v56, 0.0  ;;  %v2271_v62 = vadd.f32 %v2874_v59, %v2239_v60  ;;  %v2194_v63 = vpop.f32.mrb[45].mxu0 }
 0x1e5   : > { %2405 = vst.msk [vmem:[%s3433_s7 + $0xc0] sm:$0xff] %vm1578_vm6, %v2373_v57  ;;  %v2374_v1 = vmax.f32 %v2342_v58, 0.0  ;;  %v2269_v2 = vadd.f32 %v2237_v0, %v2194_v63  ;;  %v2875_v3 = vpop.f32.mrb[46].mxu0 }
 0x1e6   : > { %2408 = vst.msk [vmem:[%s3433_s7 + $0xd8] sm:$0xff] %vm1578_vm6, %v2376_v61  ;;  %v2309_v5 = vmul.f32 %v3527_v7, %v2271_v62  ;;  %v2272_v6 = vadd.f32 %v2875_v3, %v2240_v4  ;;  %v2197_v8 = vpop.f32.mrb[47].mxu0 }
 0x1e7   : > { %2406 = vst.msk [vmem:[%s3433_s7 + $0xc8] sm:$0xff] %vm1578_vm6, %v2374_v1  ;;  %v2307_v10 = vmul.f32 %v3527_v7, %v2269_v2  ;;  %v2270_v11 = vadd.f32 %v2238_v9, %v2197_v8 }
 0x1e8   : > { %v2347_v12 = vadd.f32 %v3536_v19, %v2309_v5  ;;  %v2310_v13 = vmul.f32 %v3527_v7, %v2272_v6 }
 0x1e9   : > { %v2345_v14 = vadd.f32 %v3536_v19, %v2307_v10  ;;  %v2308_v15 = vmul.f32 %v3527_v7, %v2270_v11 }
 0x1ea   : > { %v2379_v16 = vmax.f32 %v2347_v12, 0.0  ;;  %v2348_v17 = vadd.f32 %v3536_v19, %v2310_v13 }
 0x1eb   : > { %v2377_v18 = vmax.f32 %v2345_v14, 0.0  ;;  %v2346_v20 = vadd.f32 %v3536_v19, %v2308_v15 }
 0x1ec   : > { %2411 = vst.msk [vmem:[%s3433_s7 + $0xf0] sm:$0xff] %vm1578_vm6, %v2379_v16  ;;  %v2380_v21 = vmax.f32 %v2348_v17, 0.0 }
 0x1ed   : > { %2409 = vst.msk [vmem:[%s3433_s7 + $0xe0] sm:$0xff] %vm1578_vm6, %v2377_v18  ;;  %v2378_v22 = vmax.f32 %v2346_v20, 0.0 }
 0x1ee   : > { %2412 = vst.msk [vmem:[%s3433_s7 + $0xf8] sm:$0xff] %vm1578_vm6, %v2380_v21 }
 0x1ef   : > { %2410 = vst.msk [vmem:[%s3433_s7 + $0xe8] sm:$0xff] %vm1578_vm6, %v2378_v22 }
 0x1f0 PF: > { %s15_s20 = sadd.s32 1, %s3032_s20   ;;  %s3780_s18 = smov %s3028_s19 }
 0x1f1   : > { %p12_p5 = scmp.ge.s32.totalorder %s15_s20, 4   ;;  %s3781_s19 = smov %s3783_s21 }
 0x1f3   :  { %14 = sbr.rel (!%p12_p5) target bundleno = 2 (0x2), region = 78 }

</bundles_post_ra>
